<compile_context>
chip_gen: v5e
topology: v5e:2x2
jax: 0.10.0
libtpu: 0.0.40
codegen_flags: <defaults>
</compile_context>

<pallas_src>
import jax
import jax.numpy as jnp
from jax.experimental import pallas as pl
from jax.experimental.pallas import tpu as pltpu


def _round_up(x, m):
    return ((x + m - 1) // m) * m


def _make_kernel(tokens_per_row, rows_per_block, hidden, vocab):
    P, R, H, V = tokens_per_row, rows_per_block, hidden, vocab

    def kernel(ids_ref, tys_ref, code_ref, type_ref, out_ref):
        # ids_ref / tys_ref : (n_pad,) int32 in SMEM (scalar prefetch).
        # code_ref          : (V, H) ontology table, VMEM resident.
        # type_ref          : (2, H) type table, VMEM resident.
        # out_ref           : (R, P*H) lane-dense packed output block.
        base = pl.program_id(0) * (R * P)          # first token of this block

        def row_body(r, carry):
            t0 = base + r * P
            parts = []
            for p in range(P):                     # static unroll: P tokens / row
                tok = ids_ref[t0 + p]
                ty = tys_ref[t0 + p]
                # PyTorch would raise on OOB indices; clamp to avoid OOB VMEM reads.
                tok = jnp.minimum(jnp.maximum(tok, 0), V - 1)
                ty = jnp.minimum(jnp.maximum(ty, 0), 1)
                crow = code_ref[pl.ds(tok, 1), :].astype(jnp.float32)   # (1, H)
                trow = type_ref[pl.ds(ty, 1), :].astype(jnp.float32)    # (1, H)
                parts.append(crow + trow)
            row = parts[0] if P == 1 else jnp.concatenate(parts, axis=-1)  # (1, P*H)
            out_ref[pl.ds(r, 1), :] = row.astype(out_ref.dtype)
            return carry

        jax.lax.fori_loop(0, R, row_body, 0, unroll=(R <= 16))

    return kernel


def fuse_embeddings(code_emb, type_emb, input_ids, input_types, block_tokens=1024):
    """code_emb: [V, H], type_emb: [2, H], input_ids/input_types: [B, L] int."""
    B, L = input_ids.shape
    V, H = code_emb.shape
    n = B * L
    out_dtype = code_emb.dtype
    itemsize = jnp.dtype(out_dtype).itemsize

    # Lane packing: P tokens per 128-lane output row when H divides 128.
    P = 128 // H if (H <= 128 and 128 % H == 0) else 1
    unit = 8 * P                     # smallest (8, P*H)-aligned token granule

    if n <= unit:
        T = _round_up(n, P)          # one block == full (padded) array: no (8,.) issue
    else:
        # >= 2 blocks whenever possible so the "parallel" axis feeds both v7x
        # TensorCores; otherwise as big as block_tokens to amortise step overhead.
        T = max(unit, _round_up(min(block_tokens, -(-n // 2)), unit))
    n_pad = _round_up(n, T)
    num_blocks = n_pad // T
    rows_per_block = T // P
    n_rows = n_pad // P

    ids = input_ids.reshape(-1).astype(jnp.int32)
    tys = input_types.reshape(-1).astype(jnp.int32)
    if n_pad != n:
        ids = jnp.pad(ids, (0, n_pad - n))     # pad with valid index 0
        tys = jnp.pad(tys, (0, n_pad - n))

    kernel = _make_kernel(P, rows_per_block, H, V)

    table_bytes = (V + 2) * H * itemsize
    out_block_bytes = rows_per_block * P * H * itemsize

    # Memory-bound op: read each table once, write each token row once.
    cost = pl.CostEstimate(
        flops=n_pad * H,
        transcendentals=0,
        bytes_accessed=table_bytes + n_pad * H * itemsize + n_pad * 2 * 4,
    )

    phys_vmem = 64 << 20
    try:
        phys_vmem = int(pltpu.get_tpu_info().vmem_capacity_bytes)
    except Exception:
        pass                                    # unknown generation: assume 64 MiB
    vmem_budget = (phys_vmem * 3) // 4          # leave headroom for compiler scratch

    def run(single_buffer_tables):
        tbl_kw = (dict(pipeline_mode=pl.Buffered(1))
                  if single_buffer_tables else {})
        tbl_bufs = 1 if single_buffer_tables else 2
        need = tbl_bufs * table_bytes + 2 * out_block_bytes + (2 << 20)
        vmem_limit = int(max(1 << 20, min(vmem_budget, need)))
        # TODO(synk): if `need` > `vmem_budget` (huge vocab), switch to the HBM
        #             DMA-gather fallback instead of keeping the table resident.
        out = pl.pallas_call(
            kernel,
            out_shape=jax.ShapeDtypeStruct((n_rows, P * H), out_dtype),
            grid_spec=pltpu.PrefetchScalarGridSpec(
                num_scalar_prefetch=2,
                grid=(num_blocks,),
                in_specs=[
                    pl.BlockSpec((V, H), lambda i, ids_r, tys_r: (0, 0), **tbl_kw),
                    pl.BlockSpec((2, H), lambda i, ids_r, tys_r: (0, 0), **tbl_kw),
                ],
                out_specs=pl.BlockSpec((rows_per_block, P * H),
                                       lambda i, ids_r, tys_r: (i, 0)),
            ),
            compiler_params=pltpu.CompilerParams(
                dimension_semantics=("parallel",),
                vmem_limit_bytes=vmem_limit),
            cost_estimate=cost,
        )(ids, tys, code_emb, type_emb)
        return jax.block_until_ready(out)

    try:
        out = run(True)
    except Exception:
        # Compatibility fallback: JAX builds without pipeline_mode/Buffered(1)
        # just use the default double-buffered (still constant-index) tables.
        out = run(False)

    out = out.reshape(n_pad, H)
    if n_pad != n:
        out = out[:n]
    return out.reshape(B, L, H)


def xavier_normal(key, shape):
    fan_in, fan_out = shape[1], shape[0]
    std = (2.0 / (fan_in + fan_out)) ** 0.5
    return std * jax.random.normal(key, shape, dtype=jnp.float32)


if __name__ == "__main__":
    # Small synthetic config: code_hidden_size H=32,
    # special vocab = 4, rx vocab = 6, dx vocab = 6 -> code_vocab_size V=16.
    B, L, H = 2, 8, 32
    n_special, n_rx, n_dx = 4, 6, 6
    V = n_special + n_rx + n_dx

    key = jax.random.PRNGKey(0)
    k_sp, k_rx, k_dx, k_ty, k_ids, k_tys = jax.random.split(key, 6)

    # Deterministic parameter init (mirrors glorot / xavier_normal_ in __init__).
    special_emb = xavier_normal(k_sp, (n_special, H))
    rx_emb = xavier_normal(k_rx, (n_rx, H))        # OntologyEmbedding(rx) rows
    dx_emb = xavier_normal(k_dx, (n_dx, H))        # OntologyEmbedding(dx) rows
    # ConcatEmbeddings: concat along vocab axis (idx_mapping is identity here).
    code_emb = jnp.concatenate([special_emb, rx_emb, dx_emb], axis=0)  # [V, H]
    type_emb = xavier_normal(k_ty, (2, H))                             # [2, H]

    input_ids = jax.random.randint(k_ids, (B, L), 0, V, dtype=jnp.int32)
    input_types = jax.random.randint(k_tys, (B, L), 0, 2, dtype=jnp.int32)

    out = fuse_embeddings(code_emb, type_emb, input_ids, input_types)
    out = jax.block_until_ready(out)

    # Pure-JAX reference for correctness.
    ref = code_emb[input_ids] + type_emb[input_types]
    assert out.shape == (B, L, H)
    assert jnp.allclose(out, ref, atol=1e-6, rtol=1e-6)

    print("KERNEL_OK")
</pallas_src>

<mosaic_0001>
module attributes {stable_mosaic.version = 11 : i64} {
  func.func @kernel(%arg0: i32, %arg1: memref<16xi32, #tpu.memory_space<smem>>, %arg2: memref<16xi32, #tpu.memory_space<smem>>, %arg3: memref<16x32xf32, #tpu.memory_space<vmem>>, %arg4: memref<2x32xf32, #tpu.memory_space<vmem>>, %arg5: memref<4x128xf32, #tpu.memory_space<vmem>>) attributes {dimension_semantics = [#tpu.dimension_semantics<parallel>], iteration_bounds = array<i64: 1>, scalar_prefetch = 2 : i64, scratch_operands = 0 : i64, tpu.core_type = #tpu.core_type<tc>, window_params = [{pipeline_mode = #tpu.pipeline_mode<synchronous>, transform_indices = @transform_0, window_bounds = array<i64: 16, 32>}, {pipeline_mode = #tpu.pipeline_mode<synchronous>, transform_indices = @transform_1, window_bounds = array<i64: 2, 32>}, {transform_indices = @transform_2, window_bounds = array<i64: 4, 128>}]} {
    %c16_i32 = arith.constant 16 : i32
    %0 = arith.muli %arg0, %c16_i32 : i32
    %c0_i32 = arith.constant 0 : i32
    %c4_i32 = arith.constant 4 : i32
    %1 = arith.muli %c0_i32, %c4_i32 : i32
    %2 = arith.addi %0, %1 : i32
    %c0_i32_0 = arith.constant 0 : i32
    %3 = arith.addi %2, %c0_i32_0 : i32
    %4 = arith.index_cast %3 : i32 to index
    %5 = memref.load %arg1[%4] : memref<16xi32, #tpu.memory_space<smem>>
    %c0_i32_1 = arith.constant 0 : i32
    %6 = arith.addi %2, %c0_i32_1 : i32
    %7 = arith.index_cast %6 : i32 to index
    %8 = memref.load %arg2[%7] : memref<16xi32, #tpu.memory_space<smem>>
    %c0_i32_2 = arith.constant 0 : i32
    %9 = arith.maxsi %5, %c0_i32_2 : i32
    %c15_i32 = arith.constant 15 : i32
    %10 = arith.minsi %9, %c15_i32 : i32
    %c0_i32_3 = arith.constant 0 : i32
    %11 = arith.maxsi %8, %c0_i32_3 : i32
    %c1_i32 = arith.constant 1 : i32
    %12 = arith.minsi %11, %c1_i32 : i32
    %13 = arith.index_cast %10 : i32 to index
    %c0 = arith.constant 0 : index
    %14 = vector.load %arg3[%13, %c0] : memref<16x32xf32, #tpu.memory_space<vmem>>, vector<1x32xf32>
    %15 = arith.index_cast %12 : i32 to index
    %c0_4 = arith.constant 0 : index
    %16 = vector.load %arg4[%15, %c0_4] : memref<2x32xf32, #tpu.memory_space<vmem>>, vector<1x32xf32>
    %17 = arith.addf %14, %16 : vector<1x32xf32>
    %c1_i32_5 = arith.constant 1 : i32
    %18 = arith.addi %2, %c1_i32_5 : i32
    %19 = arith.index_cast %18 : i32 to index
    %20 = memref.load %arg1[%19] : memref<16xi32, #tpu.memory_space<smem>>
    %c1_i32_6 = arith.constant 1 : i32
    %21 = arith.addi %2, %c1_i32_6 : i32
    %22 = arith.index_cast %21 : i32 to index
    %23 = memref.load %arg2[%22] : memref<16xi32, #tpu.memory_space<smem>>
    %c0_i32_7 = arith.constant 0 : i32
    %24 = arith.maxsi %20, %c0_i32_7 : i32
    %c15_i32_8 = arith.constant 15 : i32
    %25 = arith.minsi %24, %c15_i32_8 : i32
    %c0_i32_9 = arith.constant 0 : i32
    %26 = arith.maxsi %23, %c0_i32_9 : i32
    %c1_i32_10 = arith.constant 1 : i32
    %27 = arith.minsi %26, %c1_i32_10 : i32
    %28 = arith.index_cast %25 : i32 to index
    %c0_11 = arith.constant 0 : index
    %29 = vector.load %arg3[%28, %c0_11] : memref<16x32xf32, #tpu.memory_space<vmem>>, vector<1x32xf32>
    %30 = arith.index_cast %27 : i32 to index
    %c0_12 = arith.constant 0 : index
    %31 = vector.load %arg4[%30, %c0_12] : memref<2x32xf32, #tpu.memory_space<vmem>>, vector<1x32xf32>
    %32 = arith.addf %29, %31 : vector<1x32xf32>
    %c2_i32 = arith.constant 2 : i32
    %33 = arith.addi %2, %c2_i32 : i32
    %34 = arith.index_cast %33 : i32 to index
    %35 = memref.load %arg1[%34] : memref<16xi32, #tpu.memory_space<smem>>
    %c2_i32_13 = arith.constant 2 : i32
    %36 = arith.addi %2, %c2_i32_13 : i32
    %37 = arith.index_cast %36 : i32 to index
    %38 = memref.load %arg2[%37] : memref<16xi32, #tpu.memory_space<smem>>
    %c0_i32_14 = arith.constant 0 : i32
    %39 = arith.maxsi %35, %c0_i32_14 : i32
    %c15_i32_15 = arith.constant 15 : i32
    %40 = arith.minsi %39, %c15_i32_15 : i32
    %c0_i32_16 = arith.constant 0 : i32
    %41 = arith.maxsi %38, %c0_i32_16 : i32
    %c1_i32_17 = arith.constant 1 : i32
    %42 = arith.minsi %41, %c1_i32_17 : i32
    %43 = arith.index_cast %40 : i32 to index
    %c0_18 = arith.constant 0 : index
    %44 = vector.load %arg3[%43, %c0_18] : memref<16x32xf32, #tpu.memory_space<vmem>>, vector<1x32xf32>
    %45 = arith.index_cast %42 : i32 to index
    %c0_19 = arith.constant 0 : index
    %46 = vector.load %arg4[%45, %c0_19] : memref<2x32xf32, #tpu.memory_space<vmem>>, vector<1x32xf32>
    %47 = arith.addf %44, %46 : vector<1x32xf32>
    %c3_i32 = arith.constant 3 : i32
    %48 = arith.addi %2, %c3_i32 : i32
    %49 = arith.index_cast %48 : i32 to index
    %50 = memref.load %arg1[%49] : memref<16xi32, #tpu.memory_space<smem>>
    %c3_i32_20 = arith.constant 3 : i32
    %51 = arith.addi %2, %c3_i32_20 : i32
    %52 = arith.index_cast %51 : i32 to index
    %53 = memref.load %arg2[%52] : memref<16xi32, #tpu.memory_space<smem>>
    %c0_i32_21 = arith.constant 0 : i32
    %54 = arith.maxsi %50, %c0_i32_21 : i32
    %c15_i32_22 = arith.constant 15 : i32
    %55 = arith.minsi %54, %c15_i32_22 : i32
    %c0_i32_23 = arith.constant 0 : i32
    %56 = arith.maxsi %53, %c0_i32_23 : i32
    %c1_i32_24 = arith.constant 1 : i32
    %57 = arith.minsi %56, %c1_i32_24 : i32
    %58 = arith.index_cast %55 : i32 to index
    %c0_25 = arith.constant 0 : index
    %59 = vector.load %arg3[%58, %c0_25] : memref<16x32xf32, #tpu.memory_space<vmem>>, vector<1x32xf32>
    %60 = arith.index_cast %57 : i32 to index
    %c0_26 = arith.constant 0 : index
    %61 = vector.load %arg4[%60, %c0_26] : memref<2x32xf32, #tpu.memory_space<vmem>>, vector<1x32xf32>
    %62 = arith.addf %59, %61 : vector<1x32xf32>
    %63 = tpu.concatenate %17, %32, %47, %62 in 1 : vector<1x32xf32>, vector<1x32xf32>, vector<1x32xf32>, vector<1x32xf32> -> vector<1x128xf32>
    %64 = arith.index_cast %c0_i32 : i32 to index
    %c0_27 = arith.constant 0 : index
    %65 = vector.load %arg5[%64, %c0_27] : memref<4x128xf32, #tpu.memory_space<vmem>>, vector<1x128xf32>
    tpu.vector_store %arg5[%64, %c0_27], %63 {strides = array<i32>} : memref<4x128xf32, #tpu.memory_space<vmem>>, vector<1x128xf32>,
    %c1_i32_28 = arith.constant 1 : i32
    %c4_i32_29 = arith.constant 4 : i32
    %66 = arith.muli %c1_i32_28, %c4_i32_29 : i32
    %67 = arith.addi %0, %66 : i32
    %c0_i32_30 = arith.constant 0 : i32
    %68 = arith.addi %67, %c0_i32_30 : i32
    %69 = arith.index_cast %68 : i32 to index
    %70 = memref.load %arg1[%69] : memref<16xi32, #tpu.memory_space<smem>>
    %c0_i32_31 = arith.constant 0 : i32
    %71 = arith.addi %67, %c0_i32_31 : i32
    %72 = arith.index_cast %71 : i32 to index
    %73 = memref.load %arg2[%72] : memref<16xi32, #tpu.memory_space<smem>>
    %c0_i32_32 = arith.constant 0 : i32
    %74 = arith.maxsi %70, %c0_i32_32 : i32
    %c15_i32_33 = arith.constant 15 : i32
    %75 = arith.minsi %74, %c15_i32_33 : i32
    %c0_i32_34 = arith.constant 0 : i32
    %76 = arith.maxsi %73, %c0_i32_34 : i32
    %c1_i32_35 = arith.constant 1 : i32
    %77 = arith.minsi %76, %c1_i32_35 : i32
    %78 = arith.index_cast %75 : i32 to index
    %c0_36 = arith.constant 0 : index
    %79 = vector.load %arg3[%78, %c0_36] : memref<16x32xf32, #tpu.memory_space<vmem>>, vector<1x32xf32>
    %80 = arith.index_cast %77 : i32 to index
    %c0_37 = arith.constant 0 : index
    %81 = vector.load %arg4[%80, %c0_37] : memref<2x32xf32, #tpu.memory_space<vmem>>, vector<1x32xf32>
    %82 = arith.addf %79, %81 : vector<1x32xf32>
    %c1_i32_38 = arith.constant 1 : i32
    %83 = arith.addi %67, %c1_i32_38 : i32
    %84 = arith.index_cast %83 : i32 to index
    %85 = memref.load %arg1[%84] : memref<16xi32, #tpu.memory_space<smem>>
    %c1_i32_39 = arith.constant 1 : i32
    %86 = arith.addi %67, %c1_i32_39 : i32
    %87 = arith.index_cast %86 : i32 to index
    %88 = memref.load %arg2[%87] : memref<16xi32, #tpu.memory_space<smem>>
    %c0_i32_40 = arith.constant 0 : i32
    %89 = arith.maxsi %85, %c0_i32_40 : i32
    %c15_i32_41 = arith.constant 15 : i32
    %90 = arith.minsi %89, %c15_i32_41 : i32
    %c0_i32_42 = arith.constant 0 : i32
    %91 = arith.maxsi %88, %c0_i32_42 : i32
    %c1_i32_43 = arith.constant 1 : i32
    %92 = arith.minsi %91, %c1_i32_43 : i32
    %93 = arith.index_cast %90 : i32 to index
    %c0_44 = arith.constant 0 : index
    %94 = vector.load %arg3[%93, %c0_44] : memref<16x32xf32, #tpu.memory_space<vmem>>, vector<1x32xf32>
    %95 = arith.index_cast %92 : i32 to index
    %c0_45 = arith.constant 0 : index
    %96 = vector.load %arg4[%95, %c0_45] : memref<2x32xf32, #tpu.memory_space<vmem>>, vector<1x32xf32>
    %97 = arith.addf %94, %96 : vector<1x32xf32>
    %c2_i32_46 = arith.constant 2 : i32
    %98 = arith.addi %67, %c2_i32_46 : i32
    %99 = arith.index_cast %98 : i32 to index
    %100 = memref.load %arg1[%99] : memref<16xi32, #tpu.memory_space<smem>>
    %c2_i32_47 = arith.constant 2 : i32
    %101 = arith.addi %67, %c2_i32_47 : i32
    %102 = arith.index_cast %101 : i32 to index
    %103 = memref.load %arg2[%102] : memref<16xi32, #tpu.memory_space<smem>>
    %c0_i32_48 = arith.constant 0 : i32
    %104 = arith.maxsi %100, %c0_i32_48 : i32
    %c15_i32_49 = arith.constant 15 : i32
    %105 = arith.minsi %104, %c15_i32_49 : i32
    %c0_i32_50 = arith.constant 0 : i32
    %106 = arith.maxsi %103, %c0_i32_50 : i32
    %c1_i32_51 = arith.constant 1 : i32
    %107 = arith.minsi %106, %c1_i32_51 : i32
    %108 = arith.index_cast %105 : i32 to index
    %c0_52 = arith.constant 0 : index
    %109 = vector.load %arg3[%108, %c0_52] : memref<16x32xf32, #tpu.memory_space<vmem>>, vector<1x32xf32>
    %110 = arith.index_cast %107 : i32 to index
    %c0_53 = arith.constant 0 : index
    %111 = vector.load %arg4[%110, %c0_53] : memref<2x32xf32, #tpu.memory_space<vmem>>, vector<1x32xf32>
    %112 = arith.addf %109, %111 : vector<1x32xf32>
    %c3_i32_54 = arith.constant 3 : i32
    %113 = arith.addi %67, %c3_i32_54 : i32
    %114 = arith.index_cast %113 : i32 to index
    %115 = memref.load %arg1[%114] : memref<16xi32, #tpu.memory_space<smem>>
    %c3_i32_55 = arith.constant 3 : i32
    %116 = arith.addi %67, %c3_i32_55 : i32
    %117 = arith.index_cast %116 : i32 to index
    %118 = memref.load %arg2[%117] : memref<16xi32, #tpu.memory_space<smem>>
    %c0_i32_56 = arith.constant 0 : i32
    %119 = arith.maxsi %115, %c0_i32_56 : i32
    %c15_i32_57 = arith.constant 15 : i32
    %120 = arith.minsi %119, %c15_i32_57 : i32
    %c0_i32_58 = arith.constant 0 : i32
    %121 = arith.maxsi %118, %c0_i32_58 : i32
    %c1_i32_59 = arith.constant 1 : i32
    %122 = arith.minsi %121, %c1_i32_59 : i32
    %123 = arith.index_cast %120 : i32 to index
    %c0_60 = arith.constant 0 : index
    %124 = vector.load %arg3[%123, %c0_60] : memref<16x32xf32, #tpu.memory_space<vmem>>, vector<1x32xf32>
    %125 = arith.index_cast %122 : i32 to index
    %c0_61 = arith.constant 0 : index
    %126 = vector.load %arg4[%125, %c0_61] : memref<2x32xf32, #tpu.memory_space<vmem>>, vector<1x32xf32>
    %127 = arith.addf %124, %126 : vector<1x32xf32>
    %128 = tpu.concatenate %82, %97, %112, %127 in 1 : vector<1x32xf32>, vector<1x32xf32>, vector<1x32xf32>, vector<1x32xf32> -> vector<1x128xf32>
    %129 = arith.index_cast %c1_i32_28 : i32 to index
    %c0_62 = arith.constant 0 : index
    %130 = vector.load %arg5[%129, %c0_62] : memref<4x128xf32, #tpu.memory_space<vmem>>, vector<1x128xf32>
    tpu.vector_store %arg5[%129, %c0_62], %128 {strides = array<i32>} : memref<4x128xf32, #tpu.memory_space<vmem>>, vector<1x128xf32>,
    %c2_i32_63 = arith.constant 2 : i32
    %c4_i32_64 = arith.constant 4 : i32
    %131 = arith.muli %c2_i32_63, %c4_i32_64 : i32
    %132 = arith.addi %0, %131 : i32
    %c0_i32_65 = arith.constant 0 : i32
    %133 = arith.addi %132, %c0_i32_65 : i32
    %134 = arith.index_cast %133 : i32 to index
    %135 = memref.load %arg1[%134] : memref<16xi32, #tpu.memory_space<smem>>
    %c0_i32_66 = arith.constant 0 : i32
    %136 = arith.addi %132, %c0_i32_66 : i32
    %137 = arith.index_cast %136 : i32 to index
    %138 = memref.load %arg2[%137] : memref<16xi32, #tpu.memory_space<smem>>
    %c0_i32_67 = arith.constant 0 : i32
    %139 = arith.maxsi %135, %c0_i32_67 : i32
    %c15_i32_68 = arith.constant 15 : i32
    %140 = arith.minsi %139, %c15_i32_68 : i32
    %c0_i32_69 = arith.constant 0 : i32
    %141 = arith.maxsi %138, %c0_i32_69 : i32
    %c1_i32_70 = arith.constant 1 : i32
    %142 = arith.minsi %141, %c1_i32_70 : i32
    %143 = arith.index_cast %140 : i32 to index
    %c0_71 = arith.constant 0 : index
    %144 = vector.load %arg3[%143, %c0_71] : memref<16x32xf32, #tpu.memory_space<vmem>>, vector<1x32xf32>
    %145 = arith.index_cast %142 : i32 to index
    %c0_72 = arith.constant 0 : index
    %146 = vector.load %arg4[%145, %c0_72] : memref<2x32xf32, #tpu.memory_space<vmem>>, vector<1x32xf32>
    %147 = arith.addf %144, %146 : vector<1x32xf32>
    %c1_i32_73 = arith.constant 1 : i32
    %148 = arith.addi %132, %c1_i32_73 : i32
    %149 = arith.index_cast %148 : i32 to index
    %150 = memref.load %arg1[%149] : memref<16xi32, #tpu.memory_space<smem>>
    %c1_i32_74 = arith.constant 1 : i32
    %151 = arith.addi %132, %c1_i32_74 : i32
    %152 = arith.index_cast %151 : i32 to index
    %153 = memref.load %arg2[%152] : memref<16xi32, #tpu.memory_space<smem>>
    %c0_i32_75 = arith.constant 0 : i32
    %154 = arith.maxsi %150, %c0_i32_75 : i32
    %c15_i32_76 = arith.constant 15 : i32
    %155 = arith.minsi %154, %c15_i32_76 : i32
    %c0_i32_77 = arith.constant 0 : i32
    %156 = arith.maxsi %153, %c0_i32_77 : i32
    %c1_i32_78 = arith.constant 1 : i32
    %157 = arith.minsi %156, %c1_i32_78 : i32
    %158 = arith.index_cast %155 : i32 to index
    %c0_79 = arith.constant 0 : index
    %159 = vector.load %arg3[%158, %c0_79] : memref<16x32xf32, #tpu.memory_space<vmem>>, vector<1x32xf32>
    %160 = arith.index_cast %157 : i32 to index
    %c0_80 = arith.constant 0 : index
    %161 = vector.load %arg4[%160, %c0_80] : memref<2x32xf32, #tpu.memory_space<vmem>>, vector<1x32xf32>
    %162 = arith.addf %159, %161 : vector<1x32xf32>
    %c2_i32_81 = arith.constant 2 : i32
    %163 = arith.addi %132, %c2_i32_81 : i32
    %164 = arith.index_cast %163 : i32 to index
    %165 = memref.load %arg1[%164] : memref<16xi32, #tpu.memory_space<smem>>
    %c2_i32_82 = arith.constant 2 : i32
    %166 = arith.addi %132, %c2_i32_82 : i32
    %167 = arith.index_cast %166 : i32 to index
    %168 = memref.load %arg2[%167] : memref<16xi32, #tpu.memory_space<smem>>
    %c0_i32_83 = arith.constant 0 : i32
    %169 = arith.maxsi %165, %c0_i32_83 : i32
    %c15_i32_84 = arith.constant 15 : i32
    %170 = arith.minsi %169, %c15_i32_84 : i32
    %c0_i32_85 = arith.constant 0 : i32
    %171 = arith.maxsi %168, %c0_i32_85 : i32
    %c1_i32_86 = arith.constant 1 : i32
    %172 = arith.minsi %171, %c1_i32_86 : i32
    %173 = arith.index_cast %170 : i32 to index
    %c0_87 = arith.constant 0 : index
    %174 = vector.load %arg3[%173, %c0_87] : memref<16x32xf32, #tpu.memory_space<vmem>>, vector<1x32xf32>
    %175 = arith.index_cast %172 : i32 to index
    %c0_88 = arith.constant 0 : index
    %176 = vector.load %arg4[%175, %c0_88] : memref<2x32xf32, #tpu.memory_space<vmem>>, vector<1x32xf32>
    %177 = arith.addf %174, %176 : vector<1x32xf32>
    %c3_i32_89 = arith.constant 3 : i32
    %178 = arith.addi %132, %c3_i32_89 : i32
    %179 = arith.index_cast %178 : i32 to index
    %180 = memref.load %arg1[%179] : memref<16xi32, #tpu.memory_space<smem>>
    %c3_i32_90 = arith.constant 3 : i32
    %181 = arith.addi %132, %c3_i32_90 : i32
    %182 = arith.index_cast %181 : i32 to index
    %183 = memref.load %arg2[%182] : memref<16xi32, #tpu.memory_space<smem>>
    %c0_i32_91 = arith.constant 0 : i32
    %184 = arith.maxsi %180, %c0_i32_91 : i32
    %c15_i32_92 = arith.constant 15 : i32
    %185 = arith.minsi %184, %c15_i32_92 : i32
    %c0_i32_93 = arith.constant 0 : i32
    %186 = arith.maxsi %183, %c0_i32_93 : i32
    %c1_i32_94 = arith.constant 1 : i32
    %187 = arith.minsi %186, %c1_i32_94 : i32
    %188 = arith.index_cast %185 : i32 to index
    %c0_95 = arith.constant 0 : index
    %189 = vector.load %arg3[%188, %c0_95] : memref<16x32xf32, #tpu.memory_space<vmem>>, vector<1x32xf32>
    %190 = arith.index_cast %187 : i32 to index
    %c0_96 = arith.constant 0 : index
    %191 = vector.load %arg4[%190, %c0_96] : memref<2x32xf32, #tpu.memory_space<vmem>>, vector<1x32xf32>
    %192 = arith.addf %189, %191 : vector<1x32xf32>
    %193 = tpu.concatenate %147, %162, %177, %192 in 1 : vector<1x32xf32>, vector<1x32xf32>, vector<1x32xf32>, vector<1x32xf32> -> vector<1x128xf32>
    %194 = arith.index_cast %c2_i32_63 : i32 to index
    %c0_97 = arith.constant 0 : index
    %195 = vector.load %arg5[%194, %c0_97] : memref<4x128xf32, #tpu.memory_space<vmem>>, vector<1x128xf32>
    tpu.vector_store %arg5[%194, %c0_97], %193 {strides = array<i32>} : memref<4x128xf32, #tpu.memory_space<vmem>>, vector<1x128xf32>,
    %c3_i32_98 = arith.constant 3 : i32
    %c4_i32_99 = arith.constant 4 : i32
    %196 = arith.muli %c3_i32_98, %c4_i32_99 : i32
    %197 = arith.addi %0, %196 : i32
    %c0_i32_100 = arith.constant 0 : i32
    %198 = arith.addi %197, %c0_i32_100 : i32
    %199 = arith.index_cast %198 : i32 to index
    %200 = memref.load %arg1[%199] : memref<16xi32, #tpu.memory_space<smem>>
    %c0_i32_101 = arith.constant 0 : i32
    %201 = arith.addi %197, %c0_i32_101 : i32
    %202 = arith.index_cast %201 : i32 to index
    %203 = memref.load %arg2[%202] : memref<16xi32, #tpu.memory_space<smem>>
    %c0_i32_102 = arith.constant 0 : i32
    %204 = arith.maxsi %200, %c0_i32_102 : i32
    %c15_i32_103 = arith.constant 15 : i32
    %205 = arith.minsi %204, %c15_i32_103 : i32
    %c0_i32_104 = arith.constant 0 : i32
    %206 = arith.maxsi %203, %c0_i32_104 : i32
    %c1_i32_105 = arith.constant 1 : i32
    %207 = arith.minsi %206, %c1_i32_105 : i32
    %208 = arith.index_cast %205 : i32 to index
    %c0_106 = arith.constant 0 : index
    %209 = vector.load %arg3[%208, %c0_106] : memref<16x32xf32, #tpu.memory_space<vmem>>, vector<1x32xf32>
    %210 = arith.index_cast %207 : i32 to index
    %c0_107 = arith.constant 0 : index
    %211 = vector.load %arg4[%210, %c0_107] : memref<2x32xf32, #tpu.memory_space<vmem>>, vector<1x32xf32>
    %212 = arith.addf %209, %211 : vector<1x32xf32>
    %c1_i32_108 = arith.constant 1 : i32
    %213 = arith.addi %197, %c1_i32_108 : i32
    %214 = arith.index_cast %213 : i32 to index
    %215 = memref.load %arg1[%214] : memref<16xi32, #tpu.memory_space<smem>>
    %c1_i32_109 = arith.constant 1 : i32
    %216 = arith.addi %197, %c1_i32_109 : i32
    %217 = arith.index_cast %216 : i32 to index
    %218 = memref.load %arg2[%217] : memref<16xi32, #tpu.memory_space<smem>>
    %c0_i32_110 = arith.constant 0 : i32
    %219 = arith.maxsi %215, %c0_i32_110 : i32
    %c15_i32_111 = arith.constant 15 : i32
    %220 = arith.minsi %219, %c15_i32_111 : i32
    %c0_i32_112 = arith.constant 0 : i32
    %221 = arith.maxsi %218, %c0_i32_112 : i32
    %c1_i32_113 = arith.constant 1 : i32
    %222 = arith.minsi %221, %c1_i32_113 : i32
    %223 = arith.index_cast %220 : i32 to index
    %c0_114 = arith.constant 0 : index
    %224 = vector.load %arg3[%223, %c0_114] : memref<16x32xf32, #tpu.memory_space<vmem>>, vector<1x32xf32>
    %225 = arith.index_cast %222 : i32 to index
    %c0_115 = arith.constant 0 : index
    %226 = vector.load %arg4[%225, %c0_115] : memref<2x32xf32, #tpu.memory_space<vmem>>, vector<1x32xf32>
    %227 = arith.addf %224, %226 : vector<1x32xf32>
    %c2_i32_116 = arith.constant 2 : i32
    %228 = arith.addi %197, %c2_i32_116 : i32
    %229 = arith.index_cast %228 : i32 to index
    %230 = memref.load %arg1[%229] : memref<16xi32, #tpu.memory_space<smem>>
    %c2_i32_117 = arith.constant 2 : i32
    %231 = arith.addi %197, %c2_i32_117 : i32
    %232 = arith.index_cast %231 : i32 to index
    %233 = memref.load %arg2[%232] : memref<16xi32, #tpu.memory_space<smem>>
    %c0_i32_118 = arith.constant 0 : i32
    %234 = arith.maxsi %230, %c0_i32_118 : i32
    %c15_i32_119 = arith.constant 15 : i32
    %235 = arith.minsi %234, %c15_i32_119 : i32
    %c0_i32_120 = arith.constant 0 : i32
    %236 = arith.maxsi %233, %c0_i32_120 : i32
    %c1_i32_121 = arith.constant 1 : i32
    %237 = arith.minsi %236, %c1_i32_121 : i32
    %238 = arith.index_cast %235 : i32 to index
    %c0_122 = arith.constant 0 : index
    %239 = vector.load %arg3[%238, %c0_122] : memref<16x32xf32, #tpu.memory_space<vmem>>, vector<1x32xf32>
    %240 = arith.index_cast %237 : i32 to index
    %c0_123 = arith.constant 0 : index
    %241 = vector.load %arg4[%240, %c0_123] : memref<2x32xf32, #tpu.memory_space<vmem>>, vector<1x32xf32>
    %242 = arith.addf %239, %241 : vector<1x32xf32>
    %c3_i32_124 = arith.constant 3 : i32
    %243 = arith.addi %197, %c3_i32_124 : i32
    %244 = arith.index_cast %243 : i32 to index
    %245 = memref.load %arg1[%244] : memref<16xi32, #tpu.memory_space<smem>>
    %c3_i32_125 = arith.constant 3 : i32
    %246 = arith.addi %197, %c3_i32_125 : i32
    %247 = arith.index_cast %246 : i32 to index
    %248 = memref.load %arg2[%247] : memref<16xi32, #tpu.memory_space<smem>>
    %c0_i32_126 = arith.constant 0 : i32
    %249 = arith.maxsi %245, %c0_i32_126 : i32
    %c15_i32_127 = arith.constant 15 : i32
    %250 = arith.minsi %249, %c15_i32_127 : i32
    %c0_i32_128 = arith.constant 0 : i32
    %251 = arith.maxsi %248, %c0_i32_128 : i32
    %c1_i32_129 = arith.constant 1 : i32
    %252 = arith.minsi %251, %c1_i32_129 : i32
    %253 = arith.index_cast %250 : i32 to index
    %c0_130 = arith.constant 0 : index
    %254 = vector.load %arg3[%253, %c0_130] : memref<16x32xf32, #tpu.memory_space<vmem>>, vector<1x32xf32>
    %255 = arith.index_cast %252 : i32 to index
    %c0_131 = arith.constant 0 : index
    %256 = vector.load %arg4[%255, %c0_131] : memref<2x32xf32, #tpu.memory_space<vmem>>, vector<1x32xf32>
    %257 = arith.addf %254, %256 : vector<1x32xf32>
    %258 = tpu.concatenate %212, %227, %242, %257 in 1 : vector<1x32xf32>, vector<1x32xf32>, vector<1x32xf32>, vector<1x32xf32> -> vector<1x128xf32>
    %259 = arith.index_cast %c3_i32_98 : i32 to index
    %c0_132 = arith.constant 0 : index
    %260 = vector.load %arg5[%259, %c0_132] : memref<4x128xf32, #tpu.memory_space<vmem>>, vector<1x128xf32>
    tpu.vector_store %arg5[%259, %c0_132], %258 {strides = array<i32>} : memref<4x128xf32, #tpu.memory_space<vmem>>, vector<1x128xf32>,
    %c4_i32_133 = arith.constant 4 : i32
    return
  }
  func.func @transform_0(%arg0: i32, %arg1: memref<16xi32, #tpu.memory_space<smem>>, %arg2: memref<16xi32, #tpu.memory_space<smem>>) -> (i32, i32) {
    %c0_i32 = arith.constant 0 : i32
    %c0_i32_0 = arith.constant 0 : i32
    %c0_i32_1 = arith.constant 0 : i32
    return %c0_i32, %c0_i32_0 : i32, i32
  }
  func.func @transform_1(%arg0: i32, %arg1: memref<16xi32, #tpu.memory_space<smem>>, %arg2: memref<16xi32, #tpu.memory_space<smem>>) -> (i32, i32) {
    %c0_i32 = arith.constant 0 : i32
    %c0_i32_0 = arith.constant 0 : i32
    %c0_i32_1 = arith.constant 0 : i32
    return %c0_i32, %c0_i32_0 : i32, i32
  }
  func.func @transform_2(%arg0: i32, %arg1: memref<16xi32, #tpu.memory_space<smem>>, %arg2: memref<16xi32, #tpu.memory_space<smem>>) -> (i32, i32) {
    %c0_i32 = arith.constant 0 : i32
    %c0_i32_0 = arith.constant 0 : i32
    return %arg0, %c0_i32 : i32, i32
  }
}

module attributes {stable_mosaic.version = 11 : i64} {
  func.func @kernel(%arg0: i32, %arg1: memref<16xi32, #tpu.memory_space<smem>>, %arg2: memref<16xi32, #tpu.memory_space<smem>>, %arg3: memref<16x32xf32, #tpu.memory_space<vmem>>, %arg4: memref<2x32xf32, #tpu.memory_space<vmem>>, %arg5: memref<4x128xf32, #tpu.memory_space<vmem>>) attributes {dimension_semantics = [#tpu.dimension_semantics<parallel>], iteration_bounds = array<i64: 1>, scalar_prefetch = 2 : i64, scratch_operands = 0 : i64, tpu.core_type = #tpu.core_type<tc>, window_params = [{pipeline_mode = #tpu.pipeline_mode<synchronous>, transform_indices = @transform_0, window_bounds = array<i64: 16, 32>}, {pipeline_mode = #tpu.pipeline_mode<synchronous>, transform_indices = @transform_1, window_bounds = array<i64: 2, 32>}, {transform_indices = @transform_2, window_bounds = array<i64: 4, 128>}]} {
    %c16_i32 = arith.constant 16 : i32
    %0 = arith.muli %arg0, %c16_i32 : i32
    %c0_i32 = arith.constant 0 : i32
    %c4_i32 = arith.constant 4 : i32
    %1 = arith.muli %c0_i32, %c4_i32 : i32
    %2 = arith.addi %0, %1 : i32
    %c0_i32_0 = arith.constant 0 : i32
    %3 = arith.addi %2, %c0_i32_0 : i32
    %4 = arith.index_cast %3 : i32 to index
    %5 = memref.load %arg1[%4] : memref<16xi32, #tpu.memory_space<smem>>
    %c0_i32_1 = arith.constant 0 : i32
    %6 = arith.addi %2, %c0_i32_1 : i32
    %7 = arith.index_cast %6 : i32 to index
    %8 = memref.load %arg2[%7] : memref<16xi32, #tpu.memory_space<smem>>
    %c0_i32_2 = arith.constant 0 : i32
    %9 = arith.maxsi %5, %c0_i32_2 : i32
    %c15_i32 = arith.constant 15 : i32
    %10 = arith.minsi %9, %c15_i32 : i32
    %c0_i32_3 = arith.constant 0 : i32
    %11 = arith.maxsi %8, %c0_i32_3 : i32
    %c1_i32 = arith.constant 1 : i32
    %12 = arith.minsi %11, %c1_i32 : i32
    %13 = arith.index_cast %10 : i32 to index
    %c0 = arith.constant 0 : index
    %14 = vector.load %arg3[%13, %c0] : memref<16x32xf32, #tpu.memory_space<vmem>>, vector<1x32xf32>
    %15 = arith.index_cast %12 : i32 to index
    %c0_4 = arith.constant 0 : index
    %16 = vector.load %arg4[%15, %c0_4] : memref<2x32xf32, #tpu.memory_space<vmem>>, vector<1x32xf32>
    %17 = arith.addf %14, %16 : vector<1x32xf32>
    %c1_i32_5 = arith.constant 1 : i32
    %18 = arith.addi %2, %c1_i32_5 : i32
    %19 = arith.index_cast %18 : i32 to index
    %20 = memref.load %arg1[%19] : memref<16xi32, #tpu.memory_space<smem>>
    %c1_i32_6 = arith.constant 1 : i32
    %21 = arith.addi %2, %c1_i32_6 : i32
    %22 = arith.index_cast %21 : i32 to index
    %23 = memref.load %arg2[%22] : memref<16xi32, #tpu.memory_space<smem>>
    %c0_i32_7 = arith.constant 0 : i32
    %24 = arith.maxsi %20, %c0_i32_7 : i32
    %c15_i32_8 = arith.constant 15 : i32
    %25 = arith.minsi %24, %c15_i32_8 : i32
    %c0_i32_9 = arith.constant 0 : i32
    %26 = arith.maxsi %23, %c0_i32_9 : i32
    %c1_i32_10 = arith.constant 1 : i32
    %27 = arith.minsi %26, %c1_i32_10 : i32
    %28 = arith.index_cast %25 : i32 to index
    %c0_11 = arith.constant 0 : index
    %29 = vector.load %arg3[%28, %c0_11] : memref<16x32xf32, #tpu.memory_space<vmem>>, vector<1x32xf32>
    %30 = arith.index_cast %27 : i32 to index
    %c0_12 = arith.constant 0 : index
    %31 = vector.load %arg4[%30, %c0_12] : memref<2x32xf32, #tpu.memory_space<vmem>>, vector<1x32xf32>
    %32 = arith.addf %29, %31 : vector<1x32xf32>
    %c2_i32 = arith.constant 2 : i32
    %33 = arith.addi %2, %c2_i32 : i32
    %34 = arith.index_cast %33 : i32 to index
    %35 = memref.load %arg1[%34] : memref<16xi32, #tpu.memory_space<smem>>
    %c2_i32_13 = arith.constant 2 : i32
    %36 = arith.addi %2, %c2_i32_13 : i32
    %37 = arith.index_cast %36 : i32 to index
    %38 = memref.load %arg2[%37] : memref<16xi32, #tpu.memory_space<smem>>
    %c0_i32_14 = arith.constant 0 : i32
    %39 = arith.maxsi %35, %c0_i32_14 : i32
    %c15_i32_15 = arith.constant 15 : i32
    %40 = arith.minsi %39, %c15_i32_15 : i32
    %c0_i32_16 = arith.constant 0 : i32
    %41 = arith.maxsi %38, %c0_i32_16 : i32
    %c1_i32_17 = arith.constant 1 : i32
    %42 = arith.minsi %41, %c1_i32_17 : i32
    %43 = arith.index_cast %40 : i32 to index
    %c0_18 = arith.constant 0 : index
    %44 = vector.load %arg3[%43, %c0_18] : memref<16x32xf32, #tpu.memory_space<vmem>>, vector<1x32xf32>
    %45 = arith.index_cast %42 : i32 to index
    %c0_19 = arith.constant 0 : index
    %46 = vector.load %arg4[%45, %c0_19] : memref<2x32xf32, #tpu.memory_space<vmem>>, vector<1x32xf32>
    %47 = arith.addf %44, %46 : vector<1x32xf32>
    %c3_i32 = arith.constant 3 : i32
    %48 = arith.addi %2, %c3_i32 : i32
    %49 = arith.index_cast %48 : i32 to index
    %50 = memref.load %arg1[%49] : memref<16xi32, #tpu.memory_space<smem>>
    %c3_i32_20 = arith.constant 3 : i32
    %51 = arith.addi %2, %c3_i32_20 : i32
    %52 = arith.index_cast %51 : i32 to index
    %53 = memref.load %arg2[%52] : memref<16xi32, #tpu.memory_space<smem>>
    %c0_i32_21 = arith.constant 0 : i32
    %54 = arith.maxsi %50, %c0_i32_21 : i32
    %c15_i32_22 = arith.constant 15 : i32
    %55 = arith.minsi %54, %c15_i32_22 : i32
    %c0_i32_23 = arith.constant 0 : i32
    %56 = arith.maxsi %53, %c0_i32_23 : i32
    %c1_i32_24 = arith.constant 1 : i32
    %57 = arith.minsi %56, %c1_i32_24 : i32
    %58 = arith.index_cast %55 : i32 to index
    %c0_25 = arith.constant 0 : index
    %59 = vector.load %arg3[%58, %c0_25] : memref<16x32xf32, #tpu.memory_space<vmem>>, vector<1x32xf32>
    %60 = arith.index_cast %57 : i32 to index
    %c0_26 = arith.constant 0 : index
    %61 = vector.load %arg4[%60, %c0_26] : memref<2x32xf32, #tpu.memory_space<vmem>>, vector<1x32xf32>
    %62 = arith.addf %59, %61 : vector<1x32xf32>
    %63 = tpu.concatenate %17, %32, %47, %62 in 1 : vector<1x32xf32>, vector<1x32xf32>, vector<1x32xf32>, vector<1x32xf32> -> vector<1x128xf32>
    %64 = arith.index_cast %c0_i32 : i32 to index
    %c0_27 = arith.constant 0 : index
    %65 = vector.load %arg5[%64, %c0_27] : memref<4x128xf32, #tpu.memory_space<vmem>>, vector<1x128xf32>
    tpu.vector_store %arg5[%64, %c0_27], %63 {strides = array<i32>} : memref<4x128xf32, #tpu.memory_space<vmem>>, vector<1x128xf32>,
    %c1_i32_28 = arith.constant 1 : i32
    %c4_i32_29 = arith.constant 4 : i32
    %66 = arith.muli %c1_i32_28, %c4_i32_29 : i32
    %67 = arith.addi %0, %66 : i32
    %c0_i32_30 = arith.constant 0 : i32
    %68 = arith.addi %67, %c0_i32_30 : i32
    %69 = arith.index_cast %68 : i32 to index
    %70 = memref.load %arg1[%69] : memref<16xi32, #tpu.memory_space<smem>>
    %c0_i32_31 = arith.constant 0 : i32
    %71 = arith.addi %67, %c0_i32_31 : i32
    %72 = arith.index_cast %71 : i32 to index
    %73 = memref.load %arg2[%72] : memref<16xi32, #tpu.memory_space<smem>>
    %c0_i32_32 = arith.constant 0 : i32
    %74 = arith.maxsi %70, %c0_i32_32 : i32
    %c15_i32_33 = arith.constant 15 : i32
    %75 = arith.minsi %74, %c15_i32_33 : i32
    %c0_i32_34 = arith.constant 0 : i32
    %76 = arith.maxsi %73, %c0_i32_34 : i32
    %c1_i32_35 = arith.constant 1 : i32
    %77 = arith.minsi %76, %c1_i32_35 : i32
    %78 = arith.index_cast %75 : i32 to index
    %c0_36 = arith.constant 0 : index
    %79 = vector.load %arg3[%78, %c0_36] : memref<16x32xf32, #tpu.memory_space<vmem>>, vector<1x32xf32>
    %80 = arith.index_cast %77 : i32 to index
    %c0_37 = arith.constant 0 : index
    %81 = vector.load %arg4[%80, %c0_37] : memref<2x32xf32, #tpu.memory_space<vmem>>, vector<1x32xf32>
    %82 = arith.addf %79, %81 : vector<1x32xf32>
    %c1_i32_38 = arith.constant 1 : i32
    %83 = arith.addi %67, %c1_i32_38 : i32
    %84 = arith.index_cast %83 : i32 to index
    %85 = memref.load %arg1[%84] : memref<16xi32, #tpu.memory_space<smem>>
    %c1_i32_39 = arith.constant 1 : i32
    %86 = arith.addi %67, %c1_i32_39 : i32
    %87 = arith.index_cast %86 : i32 to index
    %88 = memref.load %arg2[%87] : memref<16xi32, #tpu.memory_space<smem>>
    %c0_i32_40 = arith.constant 0 : i32
    %89 = arith.maxsi %85, %c0_i32_40 : i32
    %c15_i32_41 = arith.constant 15 : i32
    %90 = arith.minsi %89, %c15_i32_41 : i32
    %c0_i32_42 = arith.constant 0 : i32
    %91 = arith.maxsi %88, %c0_i32_42 : i32
    %c1_i32_43 = arith.constant 1 : i32
    %92 = arith.minsi %91, %c1_i32_43 : i32
    %93 = arith.index_cast %90 : i32 to index
    %c0_44 = arith.constant 0 : index
    %94 = vector.load %arg3[%93, %c0_44] : memref<16x32xf32, #tpu.memory_space<vmem>>, vector<1x32xf32>
    %95 = arith.index_cast %92 : i32 to index
    %c0_45 = arith.constant 0 : index
    %96 = vector.load %arg4[%95, %c0_45] : memref<2x32xf32, #tpu.memory_space<vmem>>, vector<1x32xf32>
    %97 = arith.addf %94, %96 : vector<1x32xf32>
    %c2_i32_46 = arith.constant 2 : i32
    %98 = arith.addi %67, %c2_i32_46 : i32
    %99 = arith.index_cast %98 : i32 to index
    %100 = memref.load %arg1[%99] : memref<16xi32, #tpu.memory_space<smem>>
    %c2_i32_47 = arith.constant 2 : i32
    %101 = arith.addi %67, %c2_i32_47 : i32
    %102 = arith.index_cast %101 : i32 to index
    %103 = memref.load %arg2[%102] : memref<16xi32, #tpu.memory_space<smem>>
    %c0_i32_48 = arith.constant 0 : i32
    %104 = arith.maxsi %100, %c0_i32_48 : i32
    %c15_i32_49 = arith.constant 15 : i32
    %105 = arith.minsi %104, %c15_i32_49 : i32
    %c0_i32_50 = arith.constant 0 : i32
    %106 = arith.maxsi %103, %c0_i32_50 : i32
    %c1_i32_51 = arith.constant 1 : i32
    %107 = arith.minsi %106, %c1_i32_51 : i32
    %108 = arith.index_cast %105 : i32 to index
    %c0_52 = arith.constant 0 : index
    %109 = vector.load %arg3[%108, %c0_52] : memref<16x32xf32, #tpu.memory_space<vmem>>, vector<1x32xf32>
    %110 = arith.index_cast %107 : i32 to index
    %c0_53 = arith.constant 0 : index
    %111 = vector.load %arg4[%110, %c0_53] : memref<2x32xf32, #tpu.memory_space<vmem>>, vector<1x32xf32>
    %112 = arith.addf %109, %111 : vector<1x32xf32>
    %c3_i32_54 = arith.constant 3 : i32
    %113 = arith.addi %67, %c3_i32_54 : i32
    %114 = arith.index_cast %113 : i32 to index
    %115 = memref.load %arg1[%114] : memref<16xi32, #tpu.memory_space<smem>>
    %c3_i32_55 = arith.constant 3 : i32
    %116 = arith.addi %67, %c3_i32_55 : i32
    %117 = arith.index_cast %116 : i32 to index
    %118 = memref.load %arg2[%117] : memref<16xi32, #tpu.memory_space<smem>>
    %c0_i32_56 = arith.constant 0 : i32
    %119 = arith.maxsi %115, %c0_i32_56 : i32
    %c15_i32_57 = arith.constant 15 : i32
    %120 = arith.minsi %119, %c15_i32_57 : i32
    %c0_i32_58 = arith.constant 0 : i32
    %121 = arith.maxsi %118, %c0_i32_58 : i32
    %c1_i32_59 = arith.constant 1 : i32
    %122 = arith.minsi %121, %c1_i32_59 : i32
    %123 = arith.index_cast %120 : i32 to index
    %c0_60 = arith.constant 0 : index
    %124 = vector.load %arg3[%123, %c0_60] : memref<16x32xf32, #tpu.memory_space<vmem>>, vector<1x32xf32>
    %125 = arith.index_cast %122 : i32 to index
    %c0_61 = arith.constant 0 : index
    %126 = vector.load %arg4[%125, %c0_61] : memref<2x32xf32, #tpu.memory_space<vmem>>, vector<1x32xf32>
    %127 = arith.addf %124, %126 : vector<1x32xf32>
    %128 = tpu.concatenate %82, %97, %112, %127 in 1 : vector<1x32xf32>, vector<1x32xf32>, vector<1x32xf32>, vector<1x32xf32> -> vector<1x128xf32>
    %129 = arith.index_cast %c1_i32_28 : i32 to index
    %c0_62 = arith.constant 0 : index
    %130 = vector.load %arg5[%129, %c0_62] : memref<4x128xf32, #tpu.memory_space<vmem>>, vector<1x128xf32>
    tpu.vector_store %arg5[%129, %c0_62], %128 {strides = array<i32>} : memref<4x128xf32, #tpu.memory_space<vmem>>, vector<1x128xf32>,
    %c2_i32_63 = arith.constant 2 : i32
    %c4_i32_64 = arith.constant 4 : i32
    %131 = arith.muli %c2_i32_63, %c4_i32_64 : i32
    %132 = arith.addi %0, %131 : i32
    %c0_i32_65 = arith.constant 0 : i32
    %133 = arith.addi %132, %c0_i32_65 : i32
    %134 = arith.index_cast %133 : i32 to index
    %135 = memref.load %arg1[%134] : memref<16xi32, #tpu.memory_space<smem>>
    %c0_i32_66 = arith.constant 0 : i32
    %136 = arith.addi %132, %c0_i32_66 : i32
    %137 = arith.index_cast %136 : i32 to index
    %138 = memref.load %arg2[%137] : memref<16xi32, #tpu.memory_space<smem>>
    %c0_i32_67 = arith.constant 0 : i32
    %139 = arith.maxsi %135, %c0_i32_67 : i32
    %c15_i32_68 = arith.constant 15 : i32
    %140 = arith.minsi %139, %c15_i32_68 : i32
    %c0_i32_69 = arith.constant 0 : i32
    %141 = arith.maxsi %138, %c0_i32_69 : i32
    %c1_i32_70 = arith.constant 1 : i32
    %142 = arith.minsi %141, %c1_i32_70 : i32
    %143 = arith.index_cast %140 : i32 to index
    %c0_71 = arith.constant 0 : index
    %144 = vector.load %arg3[%143, %c0_71] : memref<16x32xf32, #tpu.memory_space<vmem>>, vector<1x32xf32>
    %145 = arith.index_cast %142 : i32 to index
    %c0_72 = arith.constant 0 : index
    %146 = vector.load %arg4[%145, %c0_72] : memref<2x32xf32, #tpu.memory_space<vmem>>, vector<1x32xf32>
    %147 = arith.addf %144, %146 : vector<1x32xf32>
    %c1_i32_73 = arith.constant 1 : i32
    %148 = arith.addi %132, %c1_i32_73 : i32
    %149 = arith.index_cast %148 : i32 to index
    %150 = memref.load %arg1[%149] : memref<16xi32, #tpu.memory_space<smem>>
    %c1_i32_74 = arith.constant 1 : i32
    %151 = arith.addi %132, %c1_i32_74 : i32
    %152 = arith.index_cast %151 : i32 to index
    %153 = memref.load %arg2[%152] : memref<16xi32, #tpu.memory_space<smem>>
    %c0_i32_75 = arith.constant 0 : i32
    %154 = arith.maxsi %150, %c0_i32_75 : i32
    %c15_i32_76 = arith.constant 15 : i32
    %155 = arith.minsi %154, %c15_i32_76 : i32
    %c0_i32_77 = arith.constant 0 : i32
    %156 = arith.maxsi %153, %c0_i32_77 : i32
    %c1_i32_78 = arith.constant 1 : i32
    %157 = arith.minsi %156, %c1_i32_78 : i32
    %158 = arith.index_cast %155 : i32 to index
    %c0_79 = arith.constant 0 : index
    %159 = vector.load %arg3[%158, %c0_79] : memref<16x32xf32, #tpu.memory_space<vmem>>, vector<1x32xf32>
    %160 = arith.index_cast %157 : i32 to index
    %c0_80 = arith.constant 0 : index
    %161 = vector.load %arg4[%160, %c0_80] : memref<2x32xf32, #tpu.memory_space<vmem>>, vector<1x32xf32>
    %162 = arith.addf %159, %161 : vector<1x32xf32>
    %c2_i32_81 = arith.constant 2 : i32
    %163 = arith.addi %132, %c2_i32_81 : i32
    %164 = arith.index_cast %163 : i32 to index
    %165 = memref.load %arg1[%164] : memref<16xi32, #tpu.memory_space<smem>>
    %c2_i32_82 = arith.constant 2 : i32
    %166 = arith.addi %132, %c2_i32_82 : i32
    %167 = arith.index_cast %166 : i32 to index
    %168 = memref.load %arg2[%167] : memref<16xi32, #tpu.memory_space<smem>>
    %c0_i32_83 = arith.constant 0 : i32
    %169 = arith.maxsi %165, %c0_i32_83 : i32
    %c15_i32_84 = arith.constant 15 : i32
    %170 = arith.minsi %169, %c15_i32_84 : i32
    %c0_i32_85 = arith.constant 0 : i32
    %171 = arith.maxsi %168, %c0_i32_85 : i32
    %c1_i32_86 = arith.constant 1 : i32
    %172 = arith.minsi %171, %c1_i32_86 : i32
    %173 = arith.index_cast %170 : i32 to index
    %c0_87 = arith.constant 0 : index
    %174 = vector.load %arg3[%173, %c0_87] : memref<16x32xf32, #tpu.memory_space<vmem>>, vector<1x32xf32>
    %175 = arith.index_cast %172 : i32 to index
    %c0_88 = arith.constant 0 : index
    %176 = vector.load %arg4[%175, %c0_88] : memref<2x32xf32, #tpu.memory_space<vmem>>, vector<1x32xf32>
    %177 = arith.addf %174, %176 : vector<1x32xf32>
    %c3_i32_89 = arith.constant 3 : i32
    %178 = arith.addi %132, %c3_i32_89 : i32
    %179 = arith.index_cast %178 : i32 to index
    %180 = memref.load %arg1[%179] : memref<16xi32, #tpu.memory_space<smem>>
    %c3_i32_90 = arith.constant 3 : i32
    %181 = arith.addi %132, %c3_i32_90 : i32
    %182 = arith.index_cast %181 : i32 to index
    %183 = memref.load %arg2[%182] : memref<16xi32, #tpu.memory_space<smem>>
    %c0_i32_91 = arith.constant 0 : i32
    %184 = arith.maxsi %180, %c0_i32_91 : i32
    %c15_i32_92 = arith.constant 15 : i32
    %185 = arith.minsi %184, %c15_i32_92 : i32
    %c0_i32_93 = arith.constant 0 : i32
    %186 = arith.maxsi %183, %c0_i32_93 : i32
    %c1_i32_94 = arith.constant 1 : i32
    %187 = arith.minsi %186, %c1_i32_94 : i32
    %188 = arith.index_cast %185 : i32 to index
    %c0_95 = arith.constant 0 : index
    %189 = vector.load %arg3[%188, %c0_95] : memref<16x32xf32, #tpu.memory_space<vmem>>, vector<1x32xf32>
    %190 = arith.index_cast %187 : i32 to index
    %c0_96 = arith.constant 0 : index
    %191 = vector.load %arg4[%190, %c0_96] : memref<2x32xf32, #tpu.memory_space<vmem>>, vector<1x32xf32>
    %192 = arith.addf %189, %191 : vector<1x32xf32>
    %193 = tpu.concatenate %147, %162, %177, %192 in 1 : vector<1x32xf32>, vector<1x32xf32>, vector<1x32xf32>, vector<1x32xf32> -> vector<1x128xf32>
    %194 = arith.index_cast %c2_i32_63 : i32 to index
    %c0_97 = arith.constant 0 : index
    %195 = vector.load %arg5[%194, %c0_97] : memref<4x128xf32, #tpu.memory_space<vmem>>, vector<1x128xf32>
    tpu.vector_store %arg5[%194, %c0_97], %193 {strides = array<i32>} : memref<4x128xf32, #tpu.memory_space<vmem>>, vector<1x128xf32>,
    %c3_i32_98 = arith.constant 3 : i32
    %c4_i32_99 = arith.constant 4 : i32
    %196 = arith.muli %c3_i32_98, %c4_i32_99 : i32
    %197 = arith.addi %0, %196 : i32
    %c0_i32_100 = arith.constant 0 : i32
    %198 = arith.addi %197, %c0_i32_100 : i32
    %199 = arith.index_cast %198 : i32 to index
    %200 = memref.load %arg1[%199] : memref<16xi32, #tpu.memory_space<smem>>
    %c0_i32_101 = arith.constant 0 : i32
    %201 = arith.addi %197, %c0_i32_101 : i32
    %202 = arith.index_cast %201 : i32 to index
    %203 = memref.load %arg2[%202] : memref<16xi32, #tpu.memory_space<smem>>
    %c0_i32_102 = arith.constant 0 : i32
    %204 = arith.maxsi %200, %c0_i32_102 : i32
    %c15_i32_103 = arith.constant 15 : i32
    %205 = arith.minsi %204, %c15_i32_103 : i32
    %c0_i32_104 = arith.constant 0 : i32
    %206 = arith.maxsi %203, %c0_i32_104 : i32
    %c1_i32_105 = arith.constant 1 : i32
    %207 = arith.minsi %206, %c1_i32_105 : i32
    %208 = arith.index_cast %205 : i32 to index
    %c0_106 = arith.constant 0 : index
    %209 = vector.load %arg3[%208, %c0_106] : memref<16x32xf32, #tpu.memory_space<vmem>>, vector<1x32xf32>
    %210 = arith.index_cast %207 : i32 to index
    %c0_107 = arith.constant 0 : index
    %211 = vector.load %arg4[%210, %c0_107] : memref<2x32xf32, #tpu.memory_space<vmem>>, vector<1x32xf32>
    %212 = arith.addf %209, %211 : vector<1x32xf32>
    %c1_i32_108 = arith.constant 1 : i32
    %213 = arith.addi %197, %c1_i32_108 : i32
    %214 = arith.index_cast %213 : i32 to index
    %215 = memref.load %arg1[%214] : memref<16xi32, #tpu.memory_space<smem>>
    %c1_i32_109 = arith.constant 1 : i32
    %216 = arith.addi %197, %c1_i32_109 : i32
    %217 = arith.index_cast %216 : i32 to index
    %218 = memref.load %arg2[%217] : memref<16xi32, #tpu.memory_space<smem>>
    %c0_i32_110 = arith.constant 0 : i32
    %219 = arith.maxsi %215, %c0_i32_110 : i32
    %c15_i32_111 = arith.constant 15 : i32
    %220 = arith.minsi %219, %c15_i32_111 : i32
    %c0_i32_112 = arith.constant 0 : i32
    %221 = arith.maxsi %218, %c0_i32_112 : i32
    %c1_i32_113 = arith.constant 1 : i32
    %222 = arith.minsi %221, %c1_i32_113 : i32
    %223 = arith.index_cast %220 : i32 to index
    %c0_114 = arith.constant 0 : index
    %224 = vector.load %arg3[%223, %c0_114] : memref<16x32xf32, #tpu.memory_space<vmem>>, vector<1x32xf32>
    %225 = arith.index_cast %222 : i32 to index
    %c0_115 = arith.constant 0 : index
    %226 = vector.load %arg4[%225, %c0_115] : memref<2x32xf32, #tpu.memory_space<vmem>>, vector<1x32xf32>
    %227 = arith.addf %224, %226 : vector<1x32xf32>
    %c2_i32_116 = arith.constant 2 : i32
    %228 = arith.addi %197, %c2_i32_116 : i32
    %229 = arith.index_cast %228 : i32 to index
    %230 = memref.load %arg1[%229] : memref<16xi32, #tpu.memory_space<smem>>
    %c2_i32_117 = arith.constant 2 : i32
    %231 = arith.addi %197, %c2_i32_117 : i32
    %232 = arith.index_cast %231 : i32 to index
    %233 = memref.load %arg2[%232] : memref<16xi32, #tpu.memory_space<smem>>
    %c0_i32_118 = arith.constant 0 : i32
    %234 = arith.maxsi %230, %c0_i32_118 : i32
    %c15_i32_119 = arith.constant 15 : i32
    %235 = arith.minsi %234, %c15_i32_119 : i32
    %c0_i32_120 = arith.constant 0 : i32
    %236 = arith.maxsi %233, %c0_i32_120 : i32
    %c1_i32_121 = arith.constant 1 : i32
    %237 = arith.minsi %236, %c1_i32_121 : i32
    %238 = arith.index_cast %235 : i32 to index
    %c0_122 = arith.constant 0 : index
    %239 = vector.load %arg3[%238, %c0_122] : memref<16x32xf32, #tpu.memory_space<vmem>>, vector<1x32xf32>
    %240 = arith.index_cast %237 : i32 to index
    %c0_123 = arith.constant 0 : index
    %241 = vector.load %arg4[%240, %c0_123] : memref<2x32xf32, #tpu.memory_space<vmem>>, vector<1x32xf32>
    %242 = arith.addf %239, %241 : vector<1x32xf32>
    %c3_i32_124 = arith.constant 3 : i32
    %243 = arith.addi %197, %c3_i32_124 : i32
    %244 = arith.index_cast %243 : i32 to index
    %245 = memref.load %arg1[%244] : memref<16xi32, #tpu.memory_space<smem>>
    %c3_i32_125 = arith.constant 3 : i32
    %246 = arith.addi %197, %c3_i32_125 : i32
    %247 = arith.index_cast %246 : i32 to index
    %248 = memref.load %arg2[%247] : memref<16xi32, #tpu.memory_space<smem>>
    %c0_i32_126 = arith.constant 0 : i32
    %249 = arith.maxsi %245, %c0_i32_126 : i32
    %c15_i32_127 = arith.constant 15 : i32
    %250 = arith.minsi %249, %c15_i32_127 : i32
    %c0_i32_128 = arith.constant 0 : i32
    %251 = arith.maxsi %248, %c0_i32_128 : i32
    %c1_i32_129 = arith.constant 1 : i32
    %252 = arith.minsi %251, %c1_i32_129 : i32
    %253 = arith.index_cast %250 : i32 to index
    %c0_130 = arith.constant 0 : index
    %254 = vector.load %arg3[%253, %c0_130] : memref<16x32xf32, #tpu.memory_space<vmem>>, vector<1x32xf32>
    %255 = arith.index_cast %252 : i32 to index
    %c0_131 = arith.constant 0 : index
    %256 = vector.load %arg4[%255, %c0_131] : memref<2x32xf32, #tpu.memory_space<vmem>>, vector<1x32xf32>
    %257 = arith.addf %254, %256 : vector<1x32xf32>
    %258 = tpu.concatenate %212, %227, %242, %257 in 1 : vector<1x32xf32>, vector<1x32xf32>, vector<1x32xf32>, vector<1x32xf32> -> vector<1x128xf32>
    %259 = arith.index_cast %c3_i32_98 : i32 to index
    %c0_132 = arith.constant 0 : index
    %260 = vector.load %arg5[%259, %c0_132] : memref<4x128xf32, #tpu.memory_space<vmem>>, vector<1x128xf32>
    tpu.vector_store %arg5[%259, %c0_132], %258 {strides = array<i32>} : memref<4x128xf32, #tpu.memory_space<vmem>>, vector<1x128xf32>,
    %c4_i32_133 = arith.constant 4 : i32
    return
  }
  func.func @transform_0(%arg0: i32, %arg1: memref<16xi32, #tpu.memory_space<smem>>, %arg2: memref<16xi32, #tpu.memory_space<smem>>) -> (i32, i32) {
    %c0_i32 = arith.constant 0 : i32
    %c0_i32_0 = arith.constant 0 : i32
    %c0_i32_1 = arith.constant 0 : i32
    return %c0_i32, %c0_i32_0 : i32, i32
  }
  func.func @transform_1(%arg0: i32, %arg1: memref<16xi32, #tpu.memory_space<smem>>, %arg2: memref<16xi32, #tpu.memory_space<smem>>) -> (i32, i32) {
    %c0_i32 = arith.constant 0 : i32
    %c0_i32_0 = arith.constant 0 : i32
    %c0_i32_1 = arith.constant 0 : i32
    return %c0_i32, %c0_i32_0 : i32, i32
  }
  func.func @transform_2(%arg0: i32, %arg1: memref<16xi32, #tpu.memory_space<smem>>, %arg2: memref<16xi32, #tpu.memory_space<smem>>) -> (i32, i32) {
    %c0_i32 = arith.constant 0 : i32
    %c0_i32_0 = arith.constant 0 : i32
    return %arg0, %c0_i32 : i32, i32
  }
}

</mosaic_0001>

<bundles_post_ra>
// kernel: tpu_custom_call.1
= control target key start
LH: loop header
LB: loop body
LE: loop exit
PB: predicated region body
PF: predicated region fallthrough
CT: control target
= control target key end

     0   :  { %s756_s21 = smov [#allocation3]   ;;  %s757_s22 = smov [#allocation4]   ;;  %s948_s0 = inlined_call_operand.hbm [shape: s32[16], index: 0, kind: input, shape index: {}]   ;;  %s949_s2 = inlined_call_operand.hbm [shape: f32[16,32], index: 2, kind: input, shape index: {}]   ;;  %s950_s3 = inlined_call_operand.vmem [shape: f32[2,32], index: 3, kind: input, shape index: {}]   ;;  %s951_s4 = inlined_call_operand.hbm [shape: f32[4,128], index: 4, kind: output, shape index: {}]   ;;  %s952_s1 = inlined_call_operand.hbm [shape: s32[16], index: 1, kind: input, shape index: {}]  }
   0x1   :  { %s10_s17 = sshll.u32 %s948_s0, 4  ;;  %s15_s20 = sshll.u32 %s952_s1, 4  ;;  %s11_s17 = int_to_ptr.hbm [resolvable:$true] %s10_s17  ;;  %s16_s20 = int_to_ptr.hbm [resolvable:$true] %s15_s20 }
   0x2   :  { %13 = dma.hbm_to_smem %s11_s17, 16, %s756_s21, [#allocation2] }
   0x3   :  { %18 = dma.hbm_to_smem %s16_s20, 16, %s757_s22, [#allocation2] }
   0x4   :  { %750 = dma.done.wait [#allocation2], 32 }
   0x5   :  { %751 = vsyncadd [#allocation2], 4294967264 }
   0x6   :  { %21 = sfence }
   0x7   :  { %22 = vsyncpa [#allocation6], 0 }
   0x8   :  { %23 = vsyncpa [#allocation7], 0  ;;  %s28_s25 = sshll.u32 %s949_s2, 4  ;;  %s758_s0 = smov [#allocation5]   ;;  %s29_s25 = int_to_ptr.hbm [resolvable:$true] %s28_s25 }
   0x9   :  { %s30_s26 = sshll.u32 %s758_s0, 4  ;;  %s759_s1 = smov 128   ;;  %s31_s26 = int_to_ptr.vmem [resolvable:$true] %s30_s26 }
   0xa   :  { %s760_s27 = smov 8  }
   0xb   :  { %36 = dma.hbm_to_vmem [thread:$0]  %s29_s25, 256, %s31_s26, [#allocation6], %s759_s1, %s759_s1, %s760_s27  }
   0xc   :  { %752 = dma.done.wait [#allocation6], 256  }
   0xd   :  { %753 = vsyncadd [#allocation6], 4294967040  ;;  %s521_s28 = sld [smem:[#allocation3 + $0x9]]  ;;  %s761_s11 = smov 32   ;;  %vm119_vm0 = vcmask 261120   ;;  %vm121_vm1 = vcmask 523264  }
   0xe   :  { %s522_s29 = sld [smem:[#allocation4 + $0x9]]  ;;  %s762_s8 = smov 64   ;;  %vm123_vm2 = vcmask 785408  }
   0xf   :  { %s425_s30 = sld [smem:[#allocation3 + $0x1]] }
  0x10   :  { %s426_s5 = sld [smem:[#allocation4 + $0x1]] }
  0x11   :  { %s799_s6 = sld [smem:[#allocation3 + $0xd]] }
  0x12   :  { %s801_s7 = sld [smem:[#allocation4 + $0xd]] }
  0x13   :  { %p225_p0 = scmp.gt.s32.totalorder %s521_s28, 0  ;;  %p523_p1 = scmp.lt.s32.totalorder %s521_s28, 15 }
  0x14   :  { %p229_p2 = scmp.gt.s32.totalorder %s522_s29, 0  ;;  %p528_p3 = scmp.lt.s32.totalorder %s522_s29, 1 }
  0x15   :  { %s954_s28 = smov (!%p225_p0, %s521_s28), 0  ;;  %p62_p4 = scmp.gt.s32.totalorder %s425_s30, 0 }
  0x16   :  { %s956_s29 = smov (!%p229_p2, %s522_s29), 0  ;;  %s958_s28 = smov (!%p523_p1, %s954_s28), 15 }
  0x17   :  { %s960_s29 = smov (!%p528_p3, %s956_s29), 1  ;;  %s233_s2 = scalar_lea.vmem [#allocation5], %s958_s28 }
  0x18   :  { %v234_v0 = vld [vmem:[%s233_s2] sm:$0x1]  ;;  %s235_s10 = scalar_lea.vmem %s950_s3, %s960_s29  ;;  %p427_p5 = scmp.lt.s32.totalorder %s425_s30, 15 }
  0x19   :  { %v236_v1 = vld [vmem:[%s235_s10] sm:$0x1]  ;;  %s962_s30 = smov (!%p62_p4, %s425_s30), 0  ;;  %p66_p6 = scmp.gt.s32.totalorder %s426_s5, 0 }
  0x1a   :  { %v237_v2 = vadd.f32 %v236_v1, %v234_v0  ;;  %p432_p7 = scmp.lt.s32.totalorder %s426_s5, 1  ;;  %s964_s30 = smov (!%p427_p5, %s962_s30), 15 }
  0x1b   :  { %s966_s5 = smov (!%p66_p6, %s426_s5), 0  ;;  %p305_p8 = scmp.gt.s32.totalorder %s799_s6, 0 }
  0x1c   :  { %271 = vrot.lane.b32.xlu1 %v237_v2, %s761_s11  ;;  %s968_s5 = smov (!%p432_p7, %s966_s5), 1  ;;  %s70_s12 = scalar_lea.vmem [#allocation5], %s964_s30 }
  0x1d   :  { %v71_v3 = vld [vmem:[%s70_s12] sm:$0x1]  ;;  %s306_s13 = scalar_select %p305_p8, %s799_s6, 0 }
  0x1e   :  { %s72_s16 = scalar_lea.vmem %s950_s3, %s968_s5  ;;  %p571_p9 = scmp.lt.s32.totalorder %s799_s6, 15 }
  0x1f   :  { %v73_v4 = vld [vmem:[%s72_s16] sm:$0x1]  ;;  %p309_p10 = scmp.gt.s32.totalorder %s801_s7, 0  ;;  %p576_p11 = scmp.lt.s32.totalorder %s801_s7, 1 }
  0x20   :  { %v74_v5 = vadd.f32 %v73_v4, %v71_v3  ;;  %s970_s13 = smov (!%p571_p9, %s306_s13), 15  ;;  %s473_s17 = sld [smem:[#allocation3 + $0x5]] }
  0x21   :  { %s972_s7 = smov (!%p309_p10, %s801_s7), 0  ;;  %s313_s18 = scalar_lea.vmem [#allocation5], %s970_s13 }
  0x22   :  { %108 = vrot.lane.b32.xlu0 %v74_v5, %s761_s11  ;;  %s974_s7 = smov (!%p576_p11, %s972_s7), 1  ;;  %v314_v6 = vld [vmem:[%s313_s18] sm:$0x1]  ;;  %s474_s19 = sld [smem:[#allocation4 + $0x5]] }
  0x23   :  { %s315_s22 = scalar_lea.vmem %s950_s3, %s974_s7  ;;  %s437_s23 = sld [smem:[#allocation3 + $0x2]] }
  0x24   :  { %v316_v7 = vld [vmem:[%s315_s22] sm:$0x1]  ;;  %s438_s24 = sld [smem:[#allocation4 + $0x2]] }
  0x25   :  { %v317_v8 = vadd.f32 %v316_v7, %v314_v6  ;;  %s820_s25 = sld [smem:[#allocation3 + $0xe]] }
  0x26   :  { %p145_p12 = scmp.gt.s32.totalorder %s473_s17, 0  ;;  %p475_p13 = scmp.lt.s32.totalorder %s473_s17, 15 }
  0x27   :  { %351 = vrot.lane.b32.xlu1 %v317_v8, %s761_s11  ;;  %s823_s0 = sld [smem:[#allocation4 + $0xe]] }
  0x28   :  { %s976_s17 = smov (!%p145_p12, %s473_s17), 0  ;;  %p149_p0 = scmp.gt.s32.totalorder %s474_s19, 0 }
  0x29   :  { %p480_p1 = scmp.lt.s32.totalorder %s474_s19, 1  ;;  %s978_s17 = smov (!%p475_p13, %s976_s17), 15 }
  0x2a   :  { %s980_s19 = smov (!%p149_p0, %s474_s19), 0  ;;  %p78_p2 = scmp.gt.s32.totalorder %s437_s23, 0 }
  0x2b   :  { %s982_s19 = smov (!%p480_p1, %s980_s19), 1  ;;  %s153_s26 = scalar_lea.vmem [#allocation5], %s978_s17 }
  0x2c   :  { %v154_v9 = vld [vmem:[%s153_s26] sm:$0x1]  ;;  %s79_s1 = scalar_select %p78_p2, %s437_s23, 0 }
  0x2d   :  { %s155_s29 = scalar_lea.vmem %s950_s3, %s982_s19  ;;  %p439_p3 = scmp.lt.s32.totalorder %s437_s23, 15 }
  0x2e   :  { %v156_v10 = vld [vmem:[%s155_s29] sm:$0x1]  ;;  %p82_p4 = scmp.gt.s32.totalorder %s438_s24, 0  ;;  %p444_p5 = scmp.lt.s32.totalorder %s438_s24, 1 }
  0x2f   :  { %v157_v11 = vadd.f32 %v156_v10, %v154_v9  ;;  %s984_s1 = smov (!%p439_p3, %s79_s1), 15  ;;  %p321_p6 = scmp.gt.s32.totalorder %s820_s25, 0 }
  0x30   :  { %s986_s24 = smov (!%p82_p4, %s438_s24), 0  ;;  %s86_s30 = scalar_lea.vmem [#allocation5], %s984_s1 }
  0x31   :  { %191 = vrot.lane.b32.xlu0 %v157_v11, %s761_s11  ;;  %s988_s24 = smov (!%p444_p5, %s986_s24), 1  ;;  %v87_v12 = vld [vmem:[%s86_s30] sm:$0x1]  ;;  %p583_p7 = scmp.lt.s32.totalorder %s820_s25, 15 }
  0x32   :  { %s322_s5 = scalar_select %p321_p6, %s820_s25, 0 }
  0x33   :  { %s88_s2 = scalar_lea.vmem %s950_s3, %s988_s24  ;;  %p325_p8 = scmp.gt.s32.totalorder %s823_s0, 0 }
  0x34   :  { %v89_v13 = vld [vmem:[%s88_s2] sm:$0x1]  ;;  %p588_p9 = scmp.lt.s32.totalorder %s823_s0, 1  ;;  %s990_s5 = smov (!%p583_p7, %s322_s5), 15 }
  0x35   :  { %v90_v14 = vadd.f32 %v89_v13, %v87_v12  ;;  %s992_s0 = smov (!%p325_p8, %s823_s0), 0  ;;  %s533_s9 = sld [smem:[#allocation3 + $0xa]] }
  0x36   :  { %s994_s0 = smov (!%p588_p9, %s992_s0), 1  ;;  %s329_s10 = scalar_lea.vmem [#allocation5], %s990_s5 }
  0x37   :  { %112 = vrot.lane.b32.xlu2 %v90_v14, %s762_s8  ;;  %v330_v15 = vld [vmem:[%s329_s10] sm:$0x1]  ;;  %s534_s11 = sld [smem:[#allocation4 + $0xa]]  ;;  %s331_s14 = scalar_lea.vmem %s950_s3, %s994_s0 }
  0x38   :  { %s485_s15 = sld [smem:[#allocation3 + $0x6]]  ;;  %v332_v16 = vld [vmem:[%s331_s14] sm:$0x1]  ;;  %s763_s10 = smov 96  }
  0x39   :  { %s486_s16 = sld [smem:[#allocation4 + $0x6]]  ;;  %v333_v17 = vadd.f32 %v332_v16, %v330_v15 }
  0x3a   :  { %s842_s17 = sld [smem:[#allocation3 + $0xb]] }
  0x3b   :  { %p241_p10 = scmp.gt.s32.totalorder %s533_s9, 0  ;;  %p535_p11 = scmp.lt.s32.totalorder %s533_s9, 15  ;;  %355 = vrot.lane.b32.xlu1 %v333_v17, %s762_s8 }
  0x3c   :  { %s845_s18 = sld [smem:[#allocation4 + $0xb]] }
  0x3d   :  { %s996_s9 = smov (!%p241_p10, %s533_s9), 0  ;;  %p245_p12 = scmp.gt.s32.totalorder %s534_s11, 0 }
  0x3e   :  { %p540_p13 = scmp.lt.s32.totalorder %s534_s11, 1  ;;  %s998_s9 = smov (!%p535_p11, %s996_s9), 15 }
  0x3f   :  { %s1000_s11 = smov (!%p245_p12, %s534_s11), 0  ;;  %p161_p0 = scmp.gt.s32.totalorder %s485_s15, 0 }
  0x40   :  { %s1002_s11 = smov (!%p540_p13, %s1000_s11), 1  ;;  %s249_s19 = scalar_lea.vmem [#allocation5], %s998_s9 }
  0x41   :  { %v250_v18 = vld [vmem:[%s249_s19] sm:$0x1]  ;;  %s162_s20 = scalar_select %p161_p0, %s485_s15, 0 }
  0x42   :  { %s251_s23 = scalar_lea.vmem %s950_s3, %s1002_s11  ;;  %p487_p1 = scmp.lt.s32.totalorder %s485_s15, 15 }
  0x43   :  { %v252_v19 = vld [vmem:[%s251_s23] sm:$0x1]  ;;  %p165_p2 = scmp.gt.s32.totalorder %s486_s16, 0  ;;  %p492_p3 = scmp.lt.s32.totalorder %s486_s16, 1 }
  0x44   :  { %v253_v20 = vadd.f32 %v252_v19, %v250_v18  ;;  %s1004_s20 = smov (!%p487_p1, %s162_s20), 15  ;;  %p257_p4 = scmp.gt.s32.totalorder %s842_s17, 0 }
  0x45   :  { %s1006_s16 = smov (!%p165_p2, %s486_s16), 0  ;;  %s169_s24 = scalar_lea.vmem [#allocation5], %s1004_s20 }
  0x46   :  { %275 = vrot.lane.b32.xlu0 %v253_v20, %s762_s8  ;;  %s1008_s16 = smov (!%p492_p3, %s1006_s16), 1  ;;  %v170_v21 = vld [vmem:[%s169_s24] sm:$0x1]  ;;  %p547_p5 = scmp.lt.s32.totalorder %s842_s17, 15 }
  0x47   :  { %s258_s25 = scalar_select %p257_p4, %s842_s17, 0 }
  0x48   :  { %s171_s1 = scalar_lea.vmem %s950_s3, %s1008_s16  ;;  %p261_p6 = scmp.gt.s32.totalorder %s845_s18, 0 }
  0x49   :  { %v172_v22 = vld [vmem:[%s171_s1] sm:$0x1]  ;;  %p552_p7 = scmp.lt.s32.totalorder %s845_s18, 1  ;;  %s1010_s25 = smov (!%p547_p5, %s258_s25), 15 }
  0x4a   :  { %v173_v23 = vadd.f32 %v172_v22, %v170_v21  ;;  %s1012_s18 = smov (!%p261_p6, %s845_s18), 0  ;;  %s497_s27 = sld [smem:[#allocation3 + $0x7]] }
  0x4b   :  { %s1014_s18 = smov (!%p552_p7, %s1012_s18), 1  ;;  %s265_s28 = scalar_lea.vmem [#allocation5], %s1010_s25 }
  0x4c   :  { %195 = vrot.lane.b32.xlu2 %v173_v23, %s762_s8  ;;  %v266_v24 = vld [vmem:[%s265_s28] sm:$0x1]  ;;  %s498_s29 = sld [smem:[#allocation4 + $0x7]]  ;;  %s267_s6 = scalar_lea.vmem %s950_s3, %s1014_s18 }
  0x4d   :  { %s449_s7 = sld [smem:[#allocation3 + $0x3]]  ;;  %v268_v25 = vld [vmem:[%s267_s6] sm:$0x1] }
  0x4e   :  { %s450_s2 = sld [smem:[#allocation4 + $0x3]]  ;;  %v269_v26 = vadd.f32 %v268_v25, %v266_v24 }
  0x4f   :  { %s864_s9 = sld [smem:[#allocation3 + $0xf]] }
  0x50   :  { %p177_p8 = scmp.gt.s32.totalorder %s497_s27, 0  ;;  %p499_p9 = scmp.lt.s32.totalorder %s497_s27, 15  ;;  %279 = vrot.lane.b32.xlu1 %v269_v26, %s763_s10 }
  0x51   :  { %s867_s8 = sld [smem:[#allocation4 + $0xf]] }
  0x52   :  { %s1016_s27 = smov (!%p177_p8, %s497_s27), 0  ;;  %p181_p10 = scmp.gt.s32.totalorder %s498_s29, 0 }
  0x53   :  { %p504_p11 = scmp.lt.s32.totalorder %s498_s29, 1  ;;  %s1018_s27 = smov (!%p499_p9, %s1016_s27), 15 }
  0x54   :  { %s1020_s29 = smov (!%p181_p10, %s498_s29), 0  ;;  %p94_p12 = scmp.gt.s32.totalorder %s449_s7, 0 }
  0x55   :  { %s1022_s29 = smov (!%p504_p11, %s1020_s29), 1  ;;  %s185_s11 = scalar_lea.vmem [#allocation5], %s1018_s27 }
  0x56   :  { %v186_v27 = vld [vmem:[%s185_s11] sm:$0x1]  ;;  %s95_s12 = scalar_select %p94_p12, %s449_s7, 0 }
  0x57   :  { %s187_s15 = scalar_lea.vmem %s950_s3, %s1022_s29  ;;  %p451_p13 = scmp.lt.s32.totalorder %s449_s7, 15 }
  0x58   :  { %v188_v28 = vld [vmem:[%s187_s15] sm:$0x1]  ;;  %p98_p0 = scmp.gt.s32.totalorder %s450_s2, 0  ;;  %p456_p1 = scmp.lt.s32.totalorder %s450_s2, 1 }
  0x59   :  { %v189_v29 = vadd.f32 %v188_v28, %v186_v27  ;;  %s1024_s12 = smov (!%p451_p13, %s95_s12), 15  ;;  %p337_p2 = scmp.gt.s32.totalorder %s864_s9, 0 }
  0x5a   :  { %s1026_s2 = smov (!%p98_p0, %s450_s2), 0  ;;  %s102_s16 = scalar_lea.vmem [#allocation5], %s1024_s12 }
  0x5b   :  { %199 = vrot.lane.b32.xlu0 %v189_v29, %s763_s10  ;;  %s1028_s2 = smov (!%p456_p1, %s1026_s2), 1  ;;  %v103_v30 = vld [vmem:[%s102_s16] sm:$0x1]  ;;  %p595_p3 = scmp.lt.s32.totalorder %s864_s9, 15 }
  0x5c   :  { %s338_s17 = scalar_select %p337_p2, %s864_s9, 0 }
  0x5d   :  { %s104_s20 = scalar_lea.vmem %s950_s3, %s1028_s2  ;;  %p341_p4 = scmp.gt.s32.totalorder %s867_s8, 0 }
  0x5e   :  { %v105_v31 = vld [vmem:[%s104_s20] sm:$0x1]  ;;  %p600_p5 = scmp.lt.s32.totalorder %s867_s8, 1  ;;  %s1030_s17 = smov (!%p595_p3, %s338_s17), 15 }
  0x5f   :  { %v106_v32 = vadd.f32 %v105_v31, %v103_v30  ;;  %s1032_s8 = smov (!%p341_p4, %s867_s8), 0  ;;  %s345_s21 = scalar_lea.vmem [#allocation5], %s1030_s17 }
  0x60   :  { %s1034_s8 = smov (!%p600_p5, %s1032_s8), 1  ;;  %v346_v33 = vld [vmem:[%s345_s21] sm:$0x1]  ;;  %s887_s25 = sld [smem:[#allocation3 + $0x8]] }
  0x61   :  { %116 = vrot.lane.b32.xlu2 %v106_v32, %s763_s10  ;;  %s347_s24 = scalar_lea.vmem %s950_s3, %s1034_s8  ;;  %s44_s0 = sld [smem:[#allocation3]] }
  0x62   :  { %v348_v34 = vld [vmem:[%s347_s24] sm:$0x1]  ;;  %s45_s26 = sld [smem:[#allocation4]] }
  0x63   :  { %v349_v35 = vadd.f32 %v348_v34, %v346_v33  ;;  %s889_s1 = sld [smem:[#allocation4 + $0x8]] }
  0x64   :  { %s892_s27 = sld [smem:[#allocation3 + $0xc]] }
  0x65   :  { %s896_s29 = sld [smem:[#allocation4 + $0xc]] }
  0x66   :  { %p209_p6 = scmp.gt.s32.totalorder %s887_s25, 0  ;;  %p511_p12 = scmp.lt.s32.totalorder %s887_s25, 15 }
  0x67   :  { %p46_p7 = scmp.gt.s32.totalorder %s44_s0, 0  ;;  %p415_p10 = scmp.lt.s32.totalorder %s44_s0, 15 }
  0x68   :  { %s210_s28 = scalar_select %p209_p6, %s887_s25, 0 }
  0x69   :  { %359 = vrot.lane.b32.xlu2 %v349_v35, %s763_s10  ;;  %p50_p8 = scmp.gt.s32.totalorder %s45_s26, 0  ;;  %p213_p9 = scmp.gt.s32.totalorder %s889_s1, 0 }
  0x6a   :  { %s47_s30 = scalar_select %p46_p7, %s44_s0, 0 }
  0x6b   :  { %p420_p11 = scmp.lt.s32.totalorder %s45_s26, 1  ;;  %s1036_s26 = smov (!%p50_p8, %s45_s26), 0 }
  0x6c   :  { %p289_p13 = scmp.gt.s32.totalorder %s892_s27, 0  ;;  %s1038_s30 = smov (!%p415_p10, %s47_s30), 15 }
  0x6d   :  { %s214_s5 = scalar_select %p213_p9, %s889_s1, 0 }
  0x6e   :  { %s1040_s26 = smov (!%p420_p11, %s1036_s26), 1  ;;  %p516_p0 = scmp.lt.s32.totalorder %s889_s1, 1 }
  0x6f   :  { %s290_s6 = scalar_select %p289_p13, %s892_s27, 0 }
  0x70   :  { %p293_p1 = scmp.gt.s32.totalorder %s896_s29, 0  ;;  %s904_s7 = sld [smem:[#allocation3 + $0x4]] }
  0x71   :  { %s56_s10 = scalar_lea.vmem %s950_s3, %s1040_s26  ;;  %s909_s8 = sld [smem:[#allocation4 + $0x4]] }
  0x72   :  { %p559_p2 = scmp.lt.s32.totalorder %s892_s27, 15  ;;  %p564_p3 = scmp.lt.s32.totalorder %s896_s29, 1  ;;  %v57_v41 = vld [vmem:[%s56_s10] sm:$0x1] }
  0x73   :  { %s1042_s29 = smov (!%p293_p1, %s896_s29), 0  ;;  %s1044_s28 = smov (!%p511_p12, %s210_s28), 15 }
  0x74   :  { %s1046_s5 = smov (!%p516_p0, %s214_s5), 1  ;;  %s54_s11 = scalar_lea.vmem [#allocation5], %s1038_s30 }
  0x75   :  { %v55_v40 = vld [vmem:[%s54_s11] sm:$0x1]  ;;  %s1048_s6 = smov (!%p559_p2, %s290_s6), 15  ;;  %s1050_s29 = smov (!%p564_p3, %s1042_s29), 1 }
  0x76   :  { %p129_p4 = scmp.gt.s32.totalorder %s904_s7, 0  ;;  %v58_v43 = vadd.f32 %v57_v41, %v55_v40  ;;  %s219_s14 = scalar_lea.vmem %s950_s3, %s1046_s5 }
  0x77   :  { %p133_p5 = scmp.gt.s32.totalorder %s909_s8, 0  ;;  %s299_s17 = scalar_lea.vmem %s950_s3, %s1050_s29  ;;  %v220_v48 = vld [vmem:[%s219_s14] sm:$0x1] }
  0x78   :  { %p463_p6 = scmp.lt.s32.totalorder %s904_s7, 15  ;;  %p468_p7 = scmp.lt.s32.totalorder %s909_s8, 1  ;;  %v300_v51 = vld [vmem:[%s299_s17] sm:$0x1] }
  0x79   :  { %s130_s18 = scalar_select %p129_p4, %s904_s7, 0 }
  0x7a   :  { %s134_s19 = scalar_select %p133_p5, %s909_s8, 0 }
  0x7b   :  { %s217_s20 = scalar_lea.vmem [#allocation5], %s1044_s28  ;;  %s297_s21 = scalar_lea.vmem [#allocation5], %s1048_s6 }
  0x7c   :  { %v218_v47 = vld [vmem:[%s217_s20] sm:$0x1]  ;;  %s1052_s18 = smov (!%p463_p6, %s130_s18), 15  ;;  %s1054_s19 = smov (!%p468_p7, %s134_s19), 1 }
  0x7d   :  { %v298_v50 = vld [vmem:[%s297_s21] sm:$0x1]  ;;  %v221_v52 = vadd.f32 %v220_v48, %v218_v47  ;;  %s139_s24 = scalar_lea.vmem %s950_s3, %s1054_s19  ;;  %s137_s25 = scalar_lea.vmem [#allocation5], %s1052_s18 }
  0x7e   :  { %v301_v55 = vadd.f32 %v300_v51, %v298_v50  ;;  %v138_v63 = vld [vmem:[%s137_s25] sm:$0x1]  ;;  %s764_s3 = smov [#allocation8]   ;;  %s373_s27 = sshll.u32 %s951_s4, 4  ;;  %s374_s27 = int_to_ptr.hbm [resolvable:$true] %s373_s27 }
  0x7f   :  { %v140_v0 = vld [vmem:[%s139_s24] sm:$0x1]  ;;  %s371_s0 = sshll.u32 %s764_s3, 4  ;;  %s372_s0 = int_to_ptr.vmem [resolvable:$true] %s371_s0 }
  0x80   :  { %v141_v3 = vadd.f32 %v140_v0, %v138_v63 }
  0x8e   :  { %v272_v36 = vpop.permute.xlu1 %271 }
  0x8f   :  { %v282_v57 = vsel %vm119_vm0, %v221_v52, %v272_v36 }
  0x91   :  { %v113_v37 = vpop.permute.xlu2 %112 }
  0x94   :  { %v109_v38 = vpop.permute.xlu0 %108 }
  0x95   :  { %v120_v45 = vsel %vm119_vm0, %v58_v43, %v109_v38 }
  0x96   :  { %v122_v49 = vsel %vm121_vm1, %v120_v45, %v113_v37 }
  0x99   :  { %v352_v39 = vpop.permute.xlu1 %351 }
  0x9a   :  { %v362_v58 = vsel %vm119_vm0, %v301_v55, %v352_v39 }
  0xa3   :  { %v192_v44 = vpop.permute.xlu0 %191 }
  0xa4   :  { %v202_v4 = vsel %vm119_vm0, %v141_v3, %v192_v44 }
  0xa6   :  { %v196_v42 = vpop.permute.xlu2 %195 }
  0xa7   :  { %v203_v5 = vsel %vm121_vm1, %v202_v4, %v196_v42 }
  0xad   :  { %v356_v46 = vpop.permute.xlu1 %355 }
  0xae   :  { %v363_v61 = vsel %vm121_vm1, %v362_v58, %v356_v46 }
  0xb8   :  { %v276_v56 = vpop.permute.xlu0 %275 }
  0xb9   :  { %v283_v59 = vsel %vm121_vm1, %v282_v57, %v276_v56 }
  0xbb   :  { %v117_v53 = vpop.permute.xlu2 %116 }
  0xbc   :  { %v124_v54 = vsel %vm123_vm2, %v122_v49, %v117_v53 }
  0xbd   :  { %125 = vst [vmem:[#allocation8] sm:$0x1] %v124_v54 }
  0xc2   :  { %v280_v60 = vpop.permute.xlu1 %279 }
  0xc3   :  { %v284_v62 = vsel %vm123_vm2, %v283_v59, %v280_v60  ;;  %v360_v1 = vpop.permute.xlu2 %359 }
  0xc4   :  { %285 = vst [vmem:[#allocation8 + $0x2] sm:$0x1] %v284_v62  ;;  %v364_v2 = vsel %vm123_vm2, %v363_v61, %v360_v1 }
  0xc5   :  { %365 = vst [vmem:[#allocation8 + $0x3] sm:$0x1] %v364_v2 }
  0xcd   :  { %v200_v6 = vpop.permute.xlu0 %199 }
  0xce   :  { %v204_v7 = vsel %vm123_vm2, %v203_v5, %v200_v6 }
  0xcf   :  { %205 = vst [vmem:[#allocation8 + $0x1] sm:$0x1] %v204_v7 }
  0xd0   :  { %376 = dma.vmem_to_hbm [thread:$0]  %s372_s0, 64, %s374_s27, [#allocation7]  }
  0xd1   :  { %754 = dma.done.wait [#allocation7], 64  }
  0xd2   :  { %755 = vsyncadd [#allocation7], 4294967232 }
  0xd3   :  { %381 = vsyncpa [#allocation6], 1 }
  0xd4   :  { %382 = vsyncpa [#allocation7], 1 }

// kernel: tpu_custom_call.1
= control target key start
LH: loop header
LB: loop body
LE: loop exit
PB: predicated region body
PF: predicated region fallthrough
CT: control target
= control target key end

     0   :  { %s756_s21 = smov [#allocation3]   ;;  %s757_s22 = smov [#allocation4]   ;;  %s948_s0 = inlined_call_operand.hbm [shape: s32[16], index: 0, kind: input, shape index: {}]   ;;  %s949_s2 = inlined_call_operand.hbm [shape: f32[16,32], index: 2, kind: input, shape index: {}]   ;;  %s950_s3 = inlined_call_operand.vmem [shape: f32[2,32], index: 3, kind: input, shape index: {}]   ;;  %s951_s4 = inlined_call_operand.hbm [shape: f32[4,128], index: 4, kind: output, shape index: {}]   ;;  %s952_s1 = inlined_call_operand.hbm [shape: s32[16], index: 1, kind: input, shape index: {}]  }
   0x1   :  { %s10_s17 = sshll.u32 %s948_s0, 4  ;;  %s15_s20 = sshll.u32 %s952_s1, 4  ;;  %s11_s17 = int_to_ptr.hbm [resolvable:$true] %s10_s17  ;;  %s16_s20 = int_to_ptr.hbm [resolvable:$true] %s15_s20 }
   0x2   :  { %13 = dma.hbm_to_smem %s11_s17, 16, %s756_s21, [#allocation2] }
   0x3   :  { %18 = dma.hbm_to_smem %s16_s20, 16, %s757_s22, [#allocation2] }
   0x4   :  { %750 = dma.done.wait [#allocation2], 32 }
   0x5   :  { %751 = vsyncadd [#allocation2], 4294967264 }
   0x6   :  { %21 = sfence }
   0x7   :  { %22 = vsyncpa [#allocation6], 0 }
   0x8   :  { %23 = vsyncpa [#allocation7], 0  ;;  %s28_s25 = sshll.u32 %s949_s2, 4  ;;  %s758_s0 = smov [#allocation5]   ;;  %s29_s25 = int_to_ptr.hbm [resolvable:$true] %s28_s25 }
   0x9   :  { %s30_s26 = sshll.u32 %s758_s0, 4  ;;  %s759_s1 = smov 128   ;;  %s31_s26 = int_to_ptr.vmem [resolvable:$true] %s30_s26 }
   0xa   :  { %s760_s27 = smov 8  }
   0xb   :  { %36 = dma.hbm_to_vmem [thread:$0]  %s29_s25, 256, %s31_s26, [#allocation6], %s759_s1, %s759_s1, %s760_s27  }
   0xc   :  { %752 = dma.done.wait [#allocation6], 256  }
   0xd   :  { %753 = vsyncadd [#allocation6], 4294967040  ;;  %s521_s28 = sld [smem:[#allocation3 + $0x9]]  ;;  %s761_s11 = smov 32   ;;  %vm119_vm0 = vcmask 261120   ;;  %vm121_vm1 = vcmask 523264  }
   0xe   :  { %s522_s29 = sld [smem:[#allocation4 + $0x9]]  ;;  %s762_s8 = smov 64   ;;  %vm123_vm2 = vcmask 785408  }
   0xf   :  { %s425_s30 = sld [smem:[#allocation3 + $0x1]] }
  0x10   :  { %s426_s5 = sld [smem:[#allocation4 + $0x1]] }
  0x11   :  { %s799_s6 = sld [smem:[#allocation3 + $0xd]] }
  0x12   :  { %s801_s7 = sld [smem:[#allocation4 + $0xd]] }
  0x13   :  { %p225_p0 = scmp.gt.s32.totalorder %s521_s28, 0  ;;  %p523_p1 = scmp.lt.s32.totalorder %s521_s28, 15 }
  0x14   :  { %p229_p2 = scmp.gt.s32.totalorder %s522_s29, 0  ;;  %p528_p3 = scmp.lt.s32.totalorder %s522_s29, 1 }
  0x15   :  { %s954_s28 = smov (!%p225_p0, %s521_s28), 0  ;;  %p62_p4 = scmp.gt.s32.totalorder %s425_s30, 0 }
  0x16   :  { %s956_s29 = smov (!%p229_p2, %s522_s29), 0  ;;  %s958_s28 = smov (!%p523_p1, %s954_s28), 15 }
  0x17   :  { %s960_s29 = smov (!%p528_p3, %s956_s29), 1  ;;  %s233_s2 = scalar_lea.vmem [#allocation5], %s958_s28 }
  0x18   :  { %v234_v0 = vld [vmem:[%s233_s2] sm:$0x1]  ;;  %s235_s10 = scalar_lea.vmem %s950_s3, %s960_s29  ;;  %p427_p5 = scmp.lt.s32.totalorder %s425_s30, 15 }
  0x19   :  { %v236_v1 = vld [vmem:[%s235_s10] sm:$0x1]  ;;  %s962_s30 = smov (!%p62_p4, %s425_s30), 0  ;;  %p66_p6 = scmp.gt.s32.totalorder %s426_s5, 0 }
  0x1a   :  { %v237_v2 = vadd.f32 %v236_v1, %v234_v0  ;;  %p432_p7 = scmp.lt.s32.totalorder %s426_s5, 1  ;;  %s964_s30 = smov (!%p427_p5, %s962_s30), 15 }
  0x1b   :  { %s966_s5 = smov (!%p66_p6, %s426_s5), 0  ;;  %p305_p8 = scmp.gt.s32.totalorder %s799_s6, 0 }
  0x1c   :  { %271 = vrot.lane.b32.xlu1 %v237_v2, %s761_s11  ;;  %s968_s5 = smov (!%p432_p7, %s966_s5), 1  ;;  %s70_s12 = scalar_lea.vmem [#allocation5], %s964_s30 }
  0x1d   :  { %v71_v3 = vld [vmem:[%s70_s12] sm:$0x1]  ;;  %s306_s13 = scalar_select %p305_p8, %s799_s6, 0 }
  0x1e   :  { %s72_s16 = scalar_lea.vmem %s950_s3, %s968_s5  ;;  %p571_p9 = scmp.lt.s32.totalorder %s799_s6, 15 }
  0x1f   :  { %v73_v4 = vld [vmem:[%s72_s16] sm:$0x1]  ;;  %p309_p10 = scmp.gt.s32.totalorder %s801_s7, 0  ;;  %p576_p11 = scmp.lt.s32.totalorder %s801_s7, 1 }
  0x20   :  { %v74_v5 = vadd.f32 %v73_v4, %v71_v3  ;;  %s970_s13 = smov (!%p571_p9, %s306_s13), 15  ;;  %s473_s17 = sld [smem:[#allocation3 + $0x5]] }
  0x21   :  { %s972_s7 = smov (!%p309_p10, %s801_s7), 0  ;;  %s313_s18 = scalar_lea.vmem [#allocation5], %s970_s13 }
  0x22   :  { %108 = vrot.lane.b32.xlu0 %v74_v5, %s761_s11  ;;  %s974_s7 = smov (!%p576_p11, %s972_s7), 1  ;;  %v314_v6 = vld [vmem:[%s313_s18] sm:$0x1]  ;;  %s474_s19 = sld [smem:[#allocation4 + $0x5]] }
  0x23   :  { %s315_s22 = scalar_lea.vmem %s950_s3, %s974_s7  ;;  %s437_s23 = sld [smem:[#allocation3 + $0x2]] }
  0x24   :  { %v316_v7 = vld [vmem:[%s315_s22] sm:$0x1]  ;;  %s438_s24 = sld [smem:[#allocation4 + $0x2]] }
  0x25   :  { %v317_v8 = vadd.f32 %v316_v7, %v314_v6  ;;  %s820_s25 = sld [smem:[#allocation3 + $0xe]] }
  0x26   :  { %p145_p12 = scmp.gt.s32.totalorder %s473_s17, 0  ;;  %p475_p13 = scmp.lt.s32.totalorder %s473_s17, 15 }
  0x27   :  { %351 = vrot.lane.b32.xlu1 %v317_v8, %s761_s11  ;;  %s823_s0 = sld [smem:[#allocation4 + $0xe]] }
  0x28   :  { %s976_s17 = smov (!%p145_p12, %s473_s17), 0  ;;  %p149_p0 = scmp.gt.s32.totalorder %s474_s19, 0 }
  0x29   :  { %p480_p1 = scmp.lt.s32.totalorder %s474_s19, 1  ;;  %s978_s17 = smov (!%p475_p13, %s976_s17), 15 }
  0x2a   :  { %s980_s19 = smov (!%p149_p0, %s474_s19), 0  ;;  %p78_p2 = scmp.gt.s32.totalorder %s437_s23, 0 }
  0x2b   :  { %s982_s19 = smov (!%p480_p1, %s980_s19), 1  ;;  %s153_s26 = scalar_lea.vmem [#allocation5], %s978_s17 }
  0x2c   :  { %v154_v9 = vld [vmem:[%s153_s26] sm:$0x1]  ;;  %s79_s1 = scalar_select %p78_p2, %s437_s23, 0 }
  0x2d   :  { %s155_s29 = scalar_lea.vmem %s950_s3, %s982_s19  ;;  %p439_p3 = scmp.lt.s32.totalorder %s437_s23, 15 }
  0x2e   :  { %v156_v10 = vld [vmem:[%s155_s29] sm:$0x1]  ;;  %p82_p4 = scmp.gt.s32.totalorder %s438_s24, 0  ;;  %p444_p5 = scmp.lt.s32.totalorder %s438_s24, 1 }
  0x2f   :  { %v157_v11 = vadd.f32 %v156_v10, %v154_v9  ;;  %s984_s1 = smov (!%p439_p3, %s79_s1), 15  ;;  %p321_p6 = scmp.gt.s32.totalorder %s820_s25, 0 }
  0x30   :  { %s986_s24 = smov (!%p82_p4, %s438_s24), 0  ;;  %s86_s30 = scalar_lea.vmem [#allocation5], %s984_s1 }
  0x31   :  { %191 = vrot.lane.b32.xlu0 %v157_v11, %s761_s11  ;;  %s988_s24 = smov (!%p444_p5, %s986_s24), 1  ;;  %v87_v12 = vld [vmem:[%s86_s30] sm:$0x1]  ;;  %p583_p7 = scmp.lt.s32.totalorder %s820_s25, 15 }
  0x32   :  { %s322_s5 = scalar_select %p321_p6, %s820_s25, 0 }
  0x33   :  { %s88_s2 = scalar_lea.vmem %s950_s3, %s988_s24  ;;  %p325_p8 = scmp.gt.s32.totalorder %s823_s0, 0 }
  0x34   :  { %v89_v13 = vld [vmem:[%s88_s2] sm:$0x1]  ;;  %p588_p9 = scmp.lt.s32.totalorder %s823_s0, 1  ;;  %s990_s5 = smov (!%p583_p7, %s322_s5), 15 }
  0x35   :  { %v90_v14 = vadd.f32 %v89_v13, %v87_v12  ;;  %s992_s0 = smov (!%p325_p8, %s823_s0), 0  ;;  %s533_s9 = sld [smem:[#allocation3 + $0xa]] }
  0x36   :  { %s994_s0 = smov (!%p588_p9, %s992_s0), 1  ;;  %s329_s10 = scalar_lea.vmem [#allocation5], %s990_s5 }
  0x37   :  { %112 = vrot.lane.b32.xlu2 %v90_v14, %s762_s8  ;;  %v330_v15 = vld [vmem:[%s329_s10] sm:$0x1]  ;;  %s534_s11 = sld [smem:[#allocation4 + $0xa]]  ;;  %s331_s14 = scalar_lea.vmem %s950_s3, %s994_s0 }
  0x38   :  { %s485_s15 = sld [smem:[#allocation3 + $0x6]]  ;;  %v332_v16 = vld [vmem:[%s331_s14] sm:$0x1]  ;;  %s763_s10 = smov 96  }
  0x39   :  { %s486_s16 = sld [smem:[#allocation4 + $0x6]]  ;;  %v333_v17 = vadd.f32 %v332_v16, %v330_v15 }
  0x3a   :  { %s842_s17 = sld [smem:[#allocation3 + $0xb]] }
  0x3b   :  { %p241_p10 = scmp.gt.s32.totalorder %s533_s9, 0  ;;  %p535_p11 = scmp.lt.s32.totalorder %s533_s9, 15  ;;  %355 = vrot.lane.b32.xlu1 %v333_v17, %s762_s8 }
  0x3c   :  { %s845_s18 = sld [smem:[#allocation4 + $0xb]] }
  0x3d   :  { %s996_s9 = smov (!%p241_p10, %s533_s9), 0  ;;  %p245_p12 = scmp.gt.s32.totalorder %s534_s11, 0 }
  0x3e   :  { %p540_p13 = scmp.lt.s32.totalorder %s534_s11, 1  ;;  %s998_s9 = smov (!%p535_p11, %s996_s9), 15 }
  0x3f   :  { %s1000_s11 = smov (!%p245_p12, %s534_s11), 0  ;;  %p161_p0 = scmp.gt.s32.totalorder %s485_s15, 0 }
  0x40   :  { %s1002_s11 = smov (!%p540_p13, %s1000_s11), 1  ;;  %s249_s19 = scalar_lea.vmem [#allocation5], %s998_s9 }
  0x41   :  { %v250_v18 = vld [vmem:[%s249_s19] sm:$0x1]  ;;  %s162_s20 = scalar_select %p161_p0, %s485_s15, 0 }
  0x42   :  { %s251_s23 = scalar_lea.vmem %s950_s3, %s1002_s11  ;;  %p487_p1 = scmp.lt.s32.totalorder %s485_s15, 15 }
  0x43   :  { %v252_v19 = vld [vmem:[%s251_s23] sm:$0x1]  ;;  %p165_p2 = scmp.gt.s32.totalorder %s486_s16, 0  ;;  %p492_p3 = scmp.lt.s32.totalorder %s486_s16, 1 }
  0x44   :  { %v253_v20 = vadd.f32 %v252_v19, %v250_v18  ;;  %s1004_s20 = smov (!%p487_p1, %s162_s20), 15  ;;  %p257_p4 = scmp.gt.s32.totalorder %s842_s17, 0 }
  0x45   :  { %s1006_s16 = smov (!%p165_p2, %s486_s16), 0  ;;  %s169_s24 = scalar_lea.vmem [#allocation5], %s1004_s20 }
  0x46   :  { %275 = vrot.lane.b32.xlu0 %v253_v20, %s762_s8  ;;  %s1008_s16 = smov (!%p492_p3, %s1006_s16), 1  ;;  %v170_v21 = vld [vmem:[%s169_s24] sm:$0x1]  ;;  %p547_p5 = scmp.lt.s32.totalorder %s842_s17, 15 }
  0x47   :  { %s258_s25 = scalar_select %p257_p4, %s842_s17, 0 }
  0x48   :  { %s171_s1 = scalar_lea.vmem %s950_s3, %s1008_s16  ;;  %p261_p6 = scmp.gt.s32.totalorder %s845_s18, 0 }
  0x49   :  { %v172_v22 = vld [vmem:[%s171_s1] sm:$0x1]  ;;  %p552_p7 = scmp.lt.s32.totalorder %s845_s18, 1  ;;  %s1010_s25 = smov (!%p547_p5, %s258_s25), 15 }
  0x4a   :  { %v173_v23 = vadd.f32 %v172_v22, %v170_v21  ;;  %s1012_s18 = smov (!%p261_p6, %s845_s18), 0  ;;  %s497_s27 = sld [smem:[#allocation3 + $0x7]] }
  0x4b   :  { %s1014_s18 = smov (!%p552_p7, %s1012_s18), 1  ;;  %s265_s28 = scalar_lea.vmem [#allocation5], %s1010_s25 }
  0x4c   :  { %195 = vrot.lane.b32.xlu2 %v173_v23, %s762_s8  ;;  %v266_v24 = vld [vmem:[%s265_s28] sm:$0x1]  ;;  %s498_s29 = sld [smem:[#allocation4 + $0x7]]  ;;  %s267_s6 = scalar_lea.vmem %s950_s3, %s1014_s18 }
  0x4d   :  { %s449_s7 = sld [smem:[#allocation3 + $0x3]]  ;;  %v268_v25 = vld [vmem:[%s267_s6] sm:$0x1] }
  0x4e   :  { %s450_s2 = sld [smem:[#allocation4 + $0x3]]  ;;  %v269_v26 = vadd.f32 %v268_v25, %v266_v24 }
  0x4f   :  { %s864_s9 = sld [smem:[#allocation3 + $0xf]] }
  0x50   :  { %p177_p8 = scmp.gt.s32.totalorder %s497_s27, 0  ;;  %p499_p9 = scmp.lt.s32.totalorder %s497_s27, 15  ;;  %279 = vrot.lane.b32.xlu1 %v269_v26, %s763_s10 }
  0x51   :  { %s867_s8 = sld [smem:[#allocation4 + $0xf]] }
  0x52   :  { %s1016_s27 = smov (!%p177_p8, %s497_s27), 0  ;;  %p181_p10 = scmp.gt.s32.totalorder %s498_s29, 0 }
  0x53   :  { %p504_p11 = scmp.lt.s32.totalorder %s498_s29, 1  ;;  %s1018_s27 = smov (!%p499_p9, %s1016_s27), 15 }
  0x54   :  { %s1020_s29 = smov (!%p181_p10, %s498_s29), 0  ;;  %p94_p12 = scmp.gt.s32.totalorder %s449_s7, 0 }
  0x55   :  { %s1022_s29 = smov (!%p504_p11, %s1020_s29), 1  ;;  %s185_s11 = scalar_lea.vmem [#allocation5], %s1018_s27 }
  0x56   :  { %v186_v27 = vld [vmem:[%s185_s11] sm:$0x1]  ;;  %s95_s12 = scalar_select %p94_p12, %s449_s7, 0 }
  0x57   :  { %s187_s15 = scalar_lea.vmem %s950_s3, %s1022_s29  ;;  %p451_p13 = scmp.lt.s32.totalorder %s449_s7, 15 }
  0x58   :  { %v188_v28 = vld [vmem:[%s187_s15] sm:$0x1]  ;;  %p98_p0 = scmp.gt.s32.totalorder %s450_s2, 0  ;;  %p456_p1 = scmp.lt.s32.totalorder %s450_s2, 1 }
  0x59   :  { %v189_v29 = vadd.f32 %v188_v28, %v186_v27  ;;  %s1024_s12 = smov (!%p451_p13, %s95_s12), 15  ;;  %p337_p2 = scmp.gt.s32.totalorder %s864_s9, 0 }
  0x5a   :  { %s1026_s2 = smov (!%p98_p0, %s450_s2), 0  ;;  %s102_s16 = scalar_lea.vmem [#allocation5], %s1024_s12 }
  0x5b   :  { %199 = vrot.lane.b32.xlu0 %v189_v29, %s763_s10  ;;  %s1028_s2 = smov (!%p456_p1, %s1026_s2), 1  ;;  %v103_v30 = vld [vmem:[%s102_s16] sm:$0x1]  ;;  %p595_p3 = scmp.lt.s32.totalorder %s864_s9, 15 }
  0x5c   :  { %s338_s17 = scalar_select %p337_p2, %s864_s9, 0 }
  0x5d   :  { %s104_s20 = scalar_lea.vmem %s950_s3, %s1028_s2  ;;  %p341_p4 = scmp.gt.s32.totalorder %s867_s8, 0 }
  0x5e   :  { %v105_v31 = vld [vmem:[%s104_s20] sm:$0x1]  ;;  %p600_p5 = scmp.lt.s32.totalorder %s867_s8, 1  ;;  %s1030_s17 = smov (!%p595_p3, %s338_s17), 15 }
  0x5f   :  { %v106_v32 = vadd.f32 %v105_v31, %v103_v30  ;;  %s1032_s8 = smov (!%p341_p4, %s867_s8), 0  ;;  %s345_s21 = scalar_lea.vmem [#allocation5], %s1030_s17 }
  0x60   :  { %s1034_s8 = smov (!%p600_p5, %s1032_s8), 1  ;;  %v346_v33 = vld [vmem:[%s345_s21] sm:$0x1]  ;;  %s887_s25 = sld [smem:[#allocation3 + $0x8]] }
  0x61   :  { %116 = vrot.lane.b32.xlu2 %v106_v32, %s763_s10  ;;  %s347_s24 = scalar_lea.vmem %s950_s3, %s1034_s8  ;;  %s44_s0 = sld [smem:[#allocation3]] }
  0x62   :  { %v348_v34 = vld [vmem:[%s347_s24] sm:$0x1]  ;;  %s45_s26 = sld [smem:[#allocation4]] }
  0x63   :  { %v349_v35 = vadd.f32 %v348_v34, %v346_v33  ;;  %s889_s1 = sld [smem:[#allocation4 + $0x8]] }
  0x64   :  { %s892_s27 = sld [smem:[#allocation3 + $0xc]] }
  0x65   :  { %s896_s29 = sld [smem:[#allocation4 + $0xc]] }
  0x66   :  { %p209_p6 = scmp.gt.s32.totalorder %s887_s25, 0  ;;  %p511_p12 = scmp.lt.s32.totalorder %s887_s25, 15 }
  0x67   :  { %p46_p7 = scmp.gt.s32.totalorder %s44_s0, 0  ;;  %p415_p10 = scmp.lt.s32.totalorder %s44_s0, 15 }
  0x68   :  { %s210_s28 = scalar_select %p209_p6, %s887_s25, 0 }
  0x69   :  { %359 = vrot.lane.b32.xlu2 %v349_v35, %s763_s10  ;;  %p50_p8 = scmp.gt.s32.totalorder %s45_s26, 0  ;;  %p213_p9 = scmp.gt.s32.totalorder %s889_s1, 0 }
  0x6a   :  { %s47_s30 = scalar_select %p46_p7, %s44_s0, 0 }
  0x6b   :  { %p420_p11 = scmp.lt.s32.totalorder %s45_s26, 1  ;;  %s1036_s26 = smov (!%p50_p8, %s45_s26), 0 }
  0x6c   :  { %p289_p13 = scmp.gt.s32.totalorder %s892_s27, 0  ;;  %s1038_s30 = smov (!%p415_p10, %s47_s30), 15 }
  0x6d   :  { %s214_s5 = scalar_select %p213_p9, %s889_s1, 0 }
  0x6e   :  { %s1040_s26 = smov (!%p420_p11, %s1036_s26), 1  ;;  %p516_p0 = scmp.lt.s32.totalorder %s889_s1, 1 }
  0x6f   :  { %s290_s6 = scalar_select %p289_p13, %s892_s27, 0 }
  0x70   :  { %p293_p1 = scmp.gt.s32.totalorder %s896_s29, 0  ;;  %s904_s7 = sld [smem:[#allocation3 + $0x4]] }
  0x71   :  { %s56_s10 = scalar_lea.vmem %s950_s3, %s1040_s26  ;;  %s909_s8 = sld [smem:[#allocation4 + $0x4]] }
  0x72   :  { %p559_p2 = scmp.lt.s32.totalorder %s892_s27, 15  ;;  %p564_p3 = scmp.lt.s32.totalorder %s896_s29, 1  ;;  %v57_v41 = vld [vmem:[%s56_s10] sm:$0x1] }
  0x73   :  { %s1042_s29 = smov (!%p293_p1, %s896_s29), 0  ;;  %s1044_s28 = smov (!%p511_p12, %s210_s28), 15 }
  0x74   :  { %s1046_s5 = smov (!%p516_p0, %s214_s5), 1  ;;  %s54_s11 = scalar_lea.vmem [#allocation5], %s1038_s30 }
  0x75   :  { %v55_v40 = vld [vmem:[%s54_s11] sm:$0x1]  ;;  %s1048_s6 = smov (!%p559_p2, %s290_s6), 15  ;;  %s1050_s29 = smov (!%p564_p3, %s1042_s29), 1 }
  0x76   :  { %p129_p4 = scmp.gt.s32.totalorder %s904_s7, 0  ;;  %v58_v43 = vadd.f32 %v57_v41, %v55_v40  ;;  %s219_s14 = scalar_lea.vmem %s950_s3, %s1046_s5 }
  0x77   :  { %p133_p5 = scmp.gt.s32.totalorder %s909_s8, 0  ;;  %s299_s17 = scalar_lea.vmem %s950_s3, %s1050_s29  ;;  %v220_v48 = vld [vmem:[%s219_s14] sm:$0x1] }
  0x78   :  { %p463_p6 = scmp.lt.s32.totalorder %s904_s7, 15  ;;  %p468_p7 = scmp.lt.s32.totalorder %s909_s8, 1  ;;  %v300_v51 = vld [vmem:[%s299_s17] sm:$0x1] }
  0x79   :  { %s130_s18 = scalar_select %p129_p4, %s904_s7, 0 }
  0x7a   :  { %s134_s19 = scalar_select %p133_p5, %s909_s8, 0 }
  0x7b   :  { %s217_s20 = scalar_lea.vmem [#allocation5], %s1044_s28  ;;  %s297_s21 = scalar_lea.vmem [#allocation5], %s1048_s6 }
  0x7c   :  { %v218_v47 = vld [vmem:[%s217_s20] sm:$0x1]  ;;  %s1052_s18 = smov (!%p463_p6, %s130_s18), 15  ;;  %s1054_s19 = smov (!%p468_p7, %s134_s19), 1 }
  0x7d   :  { %v298_v50 = vld [vmem:[%s297_s21] sm:$0x1]  ;;  %v221_v52 = vadd.f32 %v220_v48, %v218_v47  ;;  %s139_s24 = scalar_lea.vmem %s950_s3, %s1054_s19  ;;  %s137_s25 = scalar_lea.vmem [#allocation5], %s1052_s18 }
  0x7e   :  { %v301_v55 = vadd.f32 %v300_v51, %v298_v50  ;;  %v138_v63 = vld [vmem:[%s137_s25] sm:$0x1]  ;;  %s764_s3 = smov [#allocation8]   ;;  %s373_s27 = sshll.u32 %s951_s4, 4  ;;  %s374_s27 = int_to_ptr.hbm [resolvable:$true] %s373_s27 }
  0x7f   :  { %v140_v0 = vld [vmem:[%s139_s24] sm:$0x1]  ;;  %s371_s0 = sshll.u32 %s764_s3, 4  ;;  %s372_s0 = int_to_ptr.vmem [resolvable:$true] %s371_s0 }
  0x80   :  { %v141_v3 = vadd.f32 %v140_v0, %v138_v63 }
  0x8e   :  { %v272_v36 = vpop.permute.xlu1 %271 }
  0x8f   :  { %v282_v57 = vsel %vm119_vm0, %v221_v52, %v272_v36 }
  0x91   :  { %v113_v37 = vpop.permute.xlu2 %112 }
  0x94   :  { %v109_v38 = vpop.permute.xlu0 %108 }
  0x95   :  { %v120_v45 = vsel %vm119_vm0, %v58_v43, %v109_v38 }
  0x96   :  { %v122_v49 = vsel %vm121_vm1, %v120_v45, %v113_v37 }
  0x99   :  { %v352_v39 = vpop.permute.xlu1 %351 }
  0x9a   :  { %v362_v58 = vsel %vm119_vm0, %v301_v55, %v352_v39 }
  0xa3   :  { %v192_v44 = vpop.permute.xlu0 %191 }
  0xa4   :  { %v202_v4 = vsel %vm119_vm0, %v141_v3, %v192_v44 }
  0xa6   :  { %v196_v42 = vpop.permute.xlu2 %195 }
  0xa7   :  { %v203_v5 = vsel %vm121_vm1, %v202_v4, %v196_v42 }
  0xad   :  { %v356_v46 = vpop.permute.xlu1 %355 }
  0xae   :  { %v363_v61 = vsel %vm121_vm1, %v362_v58, %v356_v46 }
  0xb8   :  { %v276_v56 = vpop.permute.xlu0 %275 }
  0xb9   :  { %v283_v59 = vsel %vm121_vm1, %v282_v57, %v276_v56 }
  0xbb   :  { %v117_v53 = vpop.permute.xlu2 %116 }
  0xbc   :  { %v124_v54 = vsel %vm123_vm2, %v122_v49, %v117_v53 }
  0xbd   :  { %125 = vst [vmem:[#allocation8] sm:$0x1] %v124_v54 }
  0xc2   :  { %v280_v60 = vpop.permute.xlu1 %279 }
  0xc3   :  { %v284_v62 = vsel %vm123_vm2, %v283_v59, %v280_v60  ;;  %v360_v1 = vpop.permute.xlu2 %359 }
  0xc4   :  { %285 = vst [vmem:[#allocation8 + $0x2] sm:$0x1] %v284_v62  ;;  %v364_v2 = vsel %vm123_vm2, %v363_v61, %v360_v1 }
  0xc5   :  { %365 = vst [vmem:[#allocation8 + $0x3] sm:$0x1] %v364_v2 }
  0xcd   :  { %v200_v6 = vpop.permute.xlu0 %199 }
  0xce   :  { %v204_v7 = vsel %vm123_vm2, %v203_v5, %v200_v6 }
  0xcf   :  { %205 = vst [vmem:[#allocation8 + $0x1] sm:$0x1] %v204_v7 }
  0xd0   :  { %376 = dma.vmem_to_hbm [thread:$0]  %s372_s0, 64, %s374_s27, [#allocation7]  }
  0xd1   :  { %754 = dma.done.wait [#allocation7], 64  }
  0xd2   :  { %755 = vsyncadd [#allocation7], 4294967232 }
  0xd3   :  { %381 = vsyncpa [#allocation6], 1 }
  0xd4   :  { %382 = vsyncpa [#allocation7], 1 }

</bundles_post_ra>
